<compile_context>
chip_gen: v7x
topology: tpu7x:2x2x1
jax: 0.10.0
libtpu: 0.0.40
codegen_flags: <defaults>
</compile_context>

<pallas_src>
import math

import jax
import jax.numpy as jnp
from jax import lax
from jax.experimental import pallas as pl
from jax.experimental.pallas import tpu as pltpu

# ---- synthetic BERT config (small, deterministic) ----
BATCH = 2
SEQ = 8
HIDDEN = 32
NUM_HEADS = 4
HEAD_DIM = HIDDEN // NUM_HEADS
INTER = 128            # intermediate (4 * hidden)
NUM_LAYERS = 2
VOCAB = 100
MAX_POS = 16
LN_EPS = 1e-12


def _layernorm(x, g, b):
    mu = jnp.mean(x, axis=-1, keepdims=True)
    var = jnp.mean((x - mu) ** 2, axis=-1, keepdims=True)
    return (x - mu) * lax.rsqrt(var + LN_EPS) * g + b


def _gelu(x):
    # TODO(synk): HF BERT uses exact erf-based GELU; tanh approximation used here.
    return 0.5 * x * (1.0 + jnp.tanh(0.7978845608028654 * (x + 0.044715 * x * x * x)))


def _make_kernel(batch, seq, hidden, num_layers, num_heads, head_dim):
    rows = batch * seq  # batch folded into the row dimension

    def kernel(emb_ref, bias_ref, labels_ref, emb_ln_ref,
               w_qkv_ref, b_qkv_ref, w_o_ref, vecs_ref,
               w_fi_ref, b_fi_ref, w_fo_ref, clf_w_ref, clf_b_ref,
               logits_ref, loss_ref):
        # embeddings already flattened to (B*S, H); embedding LayerNorm
        x0 = _layernorm(emb_ref[...], emb_ln_ref[0:1, :], emb_ln_ref[1:2, :])
        attn_bias = bias_ref[...]                        # (B*S, B*S) additive bias

        def layer(l, x):
            w_qkv = w_qkv_ref[l]                         # (H, 3H)  (W_q pre-scaled)
            b_qkv = b_qkv_ref[l]                         # (1, 3H)
            w_o3 = w_o_ref[l]                            # (NH, HD, H)
            vecs = vecs_ref[l]                           # (6, H)
            b_o, ln1_g, ln1_b = vecs[0:1, :], vecs[1:2, :], vecs[2:3, :]
            b_fo, ln2_g, ln2_b = vecs[3:4, :], vecs[4:5, :], vecs[5:6, :]
            w_fi = w_fi_ref[l]                           # (H, INTER)
            b_fi = b_fi_ref[l]                           # (1, INTER)
            w_fo = w_fo_ref[l]                           # (INTER, H)

            # fused QKV projection: one MXU push for the whole batch
            qkv = jnp.dot(x, w_qkv, preferred_element_type=jnp.float32) + b_qkv

            def heads(offset):
                # stack static lane-slices into a head-major (NH, B*S, HD) value
                return jnp.stack(
                    [qkv[:, offset + h * head_dim: offset + (h + 1) * head_dim]
                     for h in range(num_heads)], axis=0)

            q3 = heads(0)
            k3 = heads(hidden)
            v3 = heads(2 * hidden)

            # scores for all heads / all batch rows at once (scale folded into W_q)
            s = lax.dot_general(q3, k3, (((2,), (2,)), ((0,), (0,))),
                                preferred_element_type=jnp.float32)    # (NH, R, R)
            s = s + attn_bias                       # block-diagonal + padding mask
            s = s - jnp.max(s, axis=-1, keepdims=True)
            p = jnp.exp(s)
            p = p * pl.reciprocal(jnp.sum(p, axis=-1, keepdims=True), approx=True)
            ctx3 = lax.dot_general(p, v3, (((2,), (1,)), ((0,), (0,))),
                                   preferred_element_type=jnp.float32)  # (NH, R, HD)

            # output projection: sum_h ctx_h @ W_o[h]  ==  concat_h(ctx_h) @ W_o
            proj = lax.dot_general(ctx3, w_o3, (((2,), (1,)), ((0,), (0,))),
                                   preferred_element_type=jnp.float32)  # (NH, R, H)
            attn = jnp.sum(proj, axis=0) + b_o                           # (R, H)

            x = _layernorm(x + attn, ln1_g, ln1_b)
            act = _gelu(jnp.dot(x, w_fi, preferred_element_type=jnp.float32) + b_fi)
            ffn = jnp.dot(act, w_fo, preferred_element_type=jnp.float32) + b_fo
            return _layernorm(x + ffn, ln2_g, ln2_b)

        x = lax.fori_loop(0, num_layers, layer, x0, unroll=True)

        # classifier on the [CLS] rows (row b*seq per batch element), one (B,1) store
        per_row = jnp.dot(x, clf_w_ref[...], preferred_element_type=jnp.float32)  # (R,1)
        col = lax.broadcasted_iota(jnp.int32, (batch, rows), 1)
        cls_pos = lax.broadcasted_iota(jnp.int32, (batch, rows), 0) * seq
        sel = (col == cls_pos).astype(jnp.float32)                                 # (B,R)
        logits = (jnp.dot(sel, per_row, preferred_element_type=jnp.float32)
                  + clf_b_ref[...])                                                # (B,1)
        logits_ref[...] = logits

        # BCEWithLogitsLoss (numerically stable form), mean over the batch
        y = labels_ref[...]
        bce = (jnp.maximum(logits, 0.0) - logits * y
               + jnp.log(1.0 + jnp.exp(-jnp.abs(logits))))
        loss_ref[...] = jnp.sum(bce, axis=0, keepdims=True) * (1.0 / batch)

    return kernel


def init_params(key):
    keys = jax.random.split(key, 64)
    ki = iter(keys)
    std = 0.02

    def nrm(shape):
        return jax.random.normal(next(ki), shape, jnp.float32) * std

    params = {
        "word_emb": nrm((VOCAB, HIDDEN)),
        "pos_emb": nrm((MAX_POS, HIDDEN)),
        "type_emb": nrm((2, HIDDEN)),
        "emb_ln_g": jnp.ones((1, HIDDEN), jnp.float32),
        "emb_ln_b": jnp.zeros((1, HIDDEN), jnp.float32),
        "layers": [],
    }
    for _ in range(NUM_LAYERS):
        lw = [
            nrm((HIDDEN, HIDDEN)), jnp.zeros((1, HIDDEN), jnp.float32),   # W_q, b_q
            nrm((HIDDEN, HIDDEN)), jnp.zeros((1, HIDDEN), jnp.float32),   # W_k, b_k
            nrm((HIDDEN, HIDDEN)), jnp.zeros((1, HIDDEN), jnp.float32),   # W_v, b_v
            nrm((HIDDEN, HIDDEN)), jnp.zeros((1, HIDDEN), jnp.float32),   # W_o, b_o
            jnp.ones((1, HIDDEN), jnp.float32), jnp.zeros((1, HIDDEN), jnp.float32),  # LN1
            nrm((HIDDEN, INTER)), jnp.zeros((1, INTER), jnp.float32),     # W_ffn_in, b
            nrm((INTER, HIDDEN)), jnp.zeros((1, HIDDEN), jnp.float32),    # W_ffn_out, b
            jnp.ones((1, HIDDEN), jnp.float32), jnp.zeros((1, HIDDEN), jnp.float32),  # LN2
        ]
        params["layers"].append(lw)
    # classifier: nn.Linear(hidden, 1) with xavier_uniform_ weight, zero bias
    limit = math.sqrt(6.0 / (HIDDEN + 1))
    params["clf_w"] = jax.random.uniform(next(ki), (1, HIDDEN), jnp.float32,
                                         minval=-limit, maxval=limit)
    params["clf_b"] = jnp.zeros((1, 1), jnp.float32)
    return params


def pack_params(params):
    """Pack per-layer weights into a few stacked [L, ...] slabs (few, fat DMAs)."""
    scale = 1.0 / math.sqrt(HEAD_DIM)
    w_qkv, b_qkv, w_o, vecs, w_fi, b_fi, w_fo = [], [], [], [], [], [], []
    for lw in params["layers"]:
        (wq, bq, wk, bk, wv, bv, wo, bo, g1, b1,
         wi, bi, wo2, bo2, g2, b2) = lw
        # fold the 1/sqrt(head_dim) score scale into the query projection
        w_qkv.append(jnp.concatenate([wq * scale, wk, wv], axis=1))       # (H, 3H)
        b_qkv.append(jnp.concatenate([bq * scale, bk, bv], axis=1))       # (1, 3H)
        w_o.append(wo.reshape(NUM_HEADS, HEAD_DIM, HIDDEN))               # (NH, HD, H)
        vecs.append(jnp.concatenate([bo, g1, b1, bo2, g2, b2], axis=0))   # (6, H)
        w_fi.append(wi)
        b_fi.append(bi)
        w_fo.append(wo2)
    return {
        "emb_ln": jnp.concatenate([params["emb_ln_g"], params["emb_ln_b"]], axis=0),
        "w_qkv": jnp.stack(w_qkv), "b_qkv": jnp.stack(b_qkv),
        "w_o": jnp.stack(w_o), "vecs": jnp.stack(vecs),
        "w_ffn_in": jnp.stack(w_fi), "b_ffn_in": jnp.stack(b_fi),
        "w_ffn_out": jnp.stack(w_fo),
        "clf_w": params["clf_w"].T,          # (H, 1), lane-aligned dot in kernel
        "clf_b": params["clf_b"],            # (1, 1)
    }


def custom_bert_forward(input_ids, attention_mask, labels, params):
    B, S = input_ids.shape
    R = B * S
    # embedding lookup (gather) is plain-JAX glue
    # TODO(synk): token_type_ids assumed to be all zeros for every token.
    emb = (params["word_emb"][input_ids]
           + params["pos_emb"][:S][None, :, :]
           + params["type_emb"][0][None, None, :]).astype(jnp.float32)
    emb2d = emb.reshape(R, HIDDEN)

    # additive attention bias: block-diagonal over batch elements (batch is
    # folded into rows inside the kernel) combined with the key-padding mask
    row_batch = jnp.arange(R, dtype=jnp.int32) // S
    same_batch = row_batch[:, None] == row_batch[None, :]
    key_valid = attention_mask.reshape(R) > 0
    attn_bias = jnp.where(same_batch & key_valid[None, :], 0.0, -1e9).astype(jnp.float32)

    labels_f = labels.astype(jnp.float32).reshape(B, 1)   # labels.float().unsqueeze(1)
    p = pack_params(params)

    inputs = [emb2d, attn_bias, labels_f, p["emb_ln"],
              p["w_qkv"], p["b_qkv"], p["w_o"], p["vecs"],
              p["w_ffn_in"], p["b_ffn_in"], p["w_ffn_out"],
              p["clf_w"], p["clf_b"]]

    kernel = _make_kernel(B, S, HIDDEN, NUM_LAYERS, NUM_HEADS, HEAD_DIM)

    # TODO(synk): at real BERT sizes (H=768, 12 layers) the stacked weights must be
    # streamed per-layer via a grid axis + BlockSpec index_map (Buffered(2)) rather
    # than kept fully VMEM-resident (esp. on v7x's 64 MiB VMEM); fine at toy size.
    logits, loss = pl.pallas_call(
        kernel,
        out_shape=(jax.ShapeDtypeStruct((B, 1), jnp.float32),
                   jax.ShapeDtypeStruct((1, 1), jnp.float32)),
        in_specs=[pl.BlockSpec(memory_space=pltpu.MemorySpace.VMEM)] * len(inputs),
        out_specs=(pl.BlockSpec(memory_space=pltpu.MemorySpace.VMEM),
                   pl.BlockSpec(memory_space=pltpu.MemorySpace.VMEM)),
    )(*inputs)
    return {"logits": logits, "loss": loss[0, 0]}


if __name__ == "__main__":
    key = jax.random.PRNGKey(0)
    pkey, ikey, lkey = jax.random.split(key, 3)
    params = init_params(pkey)

    input_ids = jax.random.randint(ikey, (BATCH, SEQ), 0, VOCAB)
    attention_mask = jnp.ones((BATCH, SEQ), jnp.int32).at[1, 6:].set(0)  # some padding
    labels = jax.random.randint(lkey, (BATCH,), 0, 2)

    out = custom_bert_forward(input_ids, attention_mask, labels, params)
    jax.block_until_ready(out)
    assert out["logits"].shape == (BATCH, 1)
    assert out["loss"].shape == ()
    print("KERNEL_OK")
</pallas_src>

<mosaic_0001>
module attributes {stable_mosaic.version = 11 : i64} {
  func.func @kernel(%arg0: memref<16x32xf32, #tpu.memory_space<vmem>>, %arg1: memref<16x16xf32, #tpu.memory_space<vmem>>, %arg2: memref<2x1xf32, #tpu.memory_space<vmem>>, %arg3: memref<2x32xf32, #tpu.memory_space<vmem>>, %arg4: memref<2x32x96xf32, #tpu.memory_space<vmem>>, %arg5: memref<2x1x96xf32, #tpu.memory_space<vmem>>, %arg6: memref<2x4x8x32xf32, #tpu.memory_space<vmem>>, %arg7: memref<2x6x32xf32, #tpu.memory_space<vmem>>, %arg8: memref<2x32x128xf32, #tpu.memory_space<vmem>>, %arg9: memref<2x1x128xf32, #tpu.memory_space<vmem>>, %arg10: memref<2x128x32xf32, #tpu.memory_space<vmem>>, %arg11: memref<32x1xf32, #tpu.memory_space<vmem>>, %arg12: memref<1x1xf32, #tpu.memory_space<vmem>>, %arg13: memref<2x1xf32, #tpu.memory_space<vmem>>, %arg14: memref<1x1xf32, #tpu.memory_space<vmem>>) attributes {dimension_semantics = [], scalar_prefetch = 0 : i64, scratch_operands = 0 : i64, tpu.core_type = #tpu.core_type<tc>} {
    %c0 = arith.constant 0 : index
    %c0_0 = arith.constant 0 : index
    %0 = vector.load %arg0[%c0, %c0_0] : memref<16x32xf32, #tpu.memory_space<vmem>>, vector<16x32xf32>
    %c0_1 = arith.constant 0 : index
    %c0_2 = arith.constant 0 : index
    %1 = vector.load %arg3[%c0_1, %c0_2] : memref<2x32xf32, #tpu.memory_space<vmem>>, vector<1x32xf32>
    %c1 = arith.constant 1 : index
    %c0_3 = arith.constant 0 : index
    %2 = vector.load %arg3[%c1, %c0_3] : memref<2x32xf32, #tpu.memory_space<vmem>>, vector<1x32xf32>
    %cst = arith.constant dense<0.000000e+00> : vector<16xf32>
    %3 = vector.multi_reduction <add>, %0, %cst [1] : vector<16x32xf32> to vector<16xf32>
    %4 = vector.shape_cast %3 : vector<16xf32> to vector<16x1xf32>
    %cst_4 = arith.constant 3.200000e+01 : f32
    %5 = vector.broadcast %cst_4 : f32 to vector<16x1xf32>
    %6 = arith.divf %4, %5 : vector<16x1xf32>
    %7 = vector.broadcast %6 : vector<16x1xf32> to vector<16x32xf32>
    %8 = arith.subf %0, %7 : vector<16x32xf32>
    %9 = arith.mulf %8, %8 : vector<16x32xf32>
    %cst_5 = arith.constant dense<0.000000e+00> : vector<16xf32>
    %10 = vector.multi_reduction <add>, %9, %cst_5 [1] : vector<16x32xf32> to vector<16xf32>
    %11 = vector.shape_cast %10 : vector<16xf32> to vector<16x1xf32>
    %cst_6 = arith.constant 3.200000e+01 : f32
    %12 = vector.broadcast %cst_6 : f32 to vector<16x1xf32>
    %13 = arith.divf %11, %12 : vector<16x1xf32>
    %14 = vector.broadcast %6 : vector<16x1xf32> to vector<16x32xf32>
    %15 = arith.subf %0, %14 : vector<16x32xf32>
    %cst_7 = arith.constant 9.99999996E-13 : f32
    %16 = vector.broadcast %cst_7 : f32 to vector<16x1xf32>
    %17 = arith.addf %13, %16 : vector<16x1xf32>
    %18 = math.rsqrt %17 : vector<16x1xf32>
    %19 = vector.broadcast %18 : vector<16x1xf32> to vector<16x32xf32>
    %20 = arith.mulf %15, %19 : vector<16x32xf32>
    %21 = vector.broadcast %1 : vector<1x32xf32> to vector<16x32xf32>
    %22 = arith.mulf %20, %21 : vector<16x32xf32>
    %23 = vector.broadcast %2 : vector<1x32xf32> to vector<16x32xf32>
    %24 = arith.addf %22, %23 : vector<16x32xf32>
    %c0_8 = arith.constant 0 : index
    %c0_9 = arith.constant 0 : index
    %25 = vector.load %arg1[%c0_8, %c0_9] : memref<16x16xf32, #tpu.memory_space<vmem>>, vector<16x16xf32>
    %c0_i32 = arith.constant 0 : i32
    %26 = arith.index_cast %c0_i32 : i32 to index
    %c0_10 = arith.constant 0 : index
    %c0_11 = arith.constant 0 : index
    %27 = vector.load %arg4[%26, %c0_10, %c0_11] : memref<2x32x96xf32, #tpu.memory_space<vmem>>, vector<1x32x96xf32>
    %28 = vector.shape_cast %27 : vector<1x32x96xf32> to vector<32x96xf32>
    %29 = arith.index_cast %c0_i32 : i32 to index
    %c0_12 = arith.constant 0 : index
    %c0_13 = arith.constant 0 : index
    %30 = vector.load %arg5[%29, %c0_12, %c0_13] : memref<2x1x96xf32, #tpu.memory_space<vmem>>, vector<1x1x96xf32>
    %31 = vector.shape_cast %30 : vector<1x1x96xf32> to vector<1x96xf32>
    %32 = arith.index_cast %c0_i32 : i32 to index
    %c0_14 = arith.constant 0 : index
    %c0_15 = arith.constant 0 : index
    %c0_16 = arith.constant 0 : index
    %33 = vector.load %arg6[%32, %c0_14, %c0_15, %c0_16] : memref<2x4x8x32xf32, #tpu.memory_space<vmem>>, vector<1x4x8x32xf32>
    %34 = vector.shape_cast %33 : vector<1x4x8x32xf32> to vector<4x8x32xf32>
    %35 = arith.index_cast %c0_i32 : i32 to index
    %c0_17 = arith.constant 0 : index
    %c0_18 = arith.constant 0 : index
    %36 = vector.load %arg7[%35, %c0_17, %c0_18] : memref<2x6x32xf32, #tpu.memory_space<vmem>>, vector<1x6x32xf32>
    %37 = vector.shape_cast %36 : vector<1x6x32xf32> to vector<6x32xf32>
    %38 = vector.extract_strided_slice %37 {offsets = [0, 0], sizes = [1, 32], strides = [1, 1]} : vector<6x32xf32> to vector<1x32xf32>
    %39 = vector.extract_strided_slice %37 {offsets = [1, 0], sizes = [1, 32], strides = [1, 1]} : vector<6x32xf32> to vector<1x32xf32>
    %40 = vector.extract_strided_slice %37 {offsets = [2, 0], sizes = [1, 32], strides = [1, 1]} : vector<6x32xf32> to vector<1x32xf32>
    %41 = vector.extract_strided_slice %37 {offsets = [3, 0], sizes = [1, 32], strides = [1, 1]} : vector<6x32xf32> to vector<1x32xf32>
    %42 = vector.extract_strided_slice %37 {offsets = [4, 0], sizes = [1, 32], strides = [1, 1]} : vector<6x32xf32> to vector<1x32xf32>
    %43 = vector.extract_strided_slice %37 {offsets = [5, 0], sizes = [1, 32], strides = [1, 1]} : vector<6x32xf32> to vector<1x32xf32>
    %44 = arith.index_cast %c0_i32 : i32 to index
    %c0_19 = arith.constant 0 : index
    %c0_20 = arith.constant 0 : index
    %45 = vector.load %arg8[%44, %c0_19, %c0_20] : memref<2x32x128xf32, #tpu.memory_space<vmem>>, vector<1x32x128xf32>
    %46 = vector.shape_cast %45 : vector<1x32x128xf32> to vector<32x128xf32>
    %47 = arith.index_cast %c0_i32 : i32 to index
    %c0_21 = arith.constant 0 : index
    %c0_22 = arith.constant 0 : index
    %48 = vector.load %arg9[%47, %c0_21, %c0_22] : memref<2x1x128xf32, #tpu.memory_space<vmem>>, vector<1x1x128xf32>
    %49 = vector.shape_cast %48 : vector<1x1x128xf32> to vector<1x128xf32>
    %50 = arith.index_cast %c0_i32 : i32 to index
    %c0_23 = arith.constant 0 : index
    %c0_24 = arith.constant 0 : index
    %51 = vector.load %arg10[%50, %c0_23, %c0_24] : memref<2x128x32xf32, #tpu.memory_space<vmem>>, vector<1x128x32xf32>
    %52 = vector.shape_cast %51 : vector<1x128x32xf32> to vector<128x32xf32>
    %cst_25 = arith.constant dense<0.000000e+00> : vector<16x96xf32>
    %53 = tpu.matmul %24, %28, %cst_25 {dimension_numbers = #tpu.dot_dimension_numbers<[1], [0], [0], [1], [0, 0, 1, 1], [], []>} : vector<16x32xf32>, vector<32x96xf32>, vector<16x96xf32> -> vector<16x96xf32>
    %54 = vector.broadcast %31 : vector<1x96xf32> to vector<16x96xf32>
    %55 = arith.addf %53, %54 : vector<16x96xf32>
    %56 = vector.extract_strided_slice %55 {offsets = [0, 0], sizes = [16, 8], strides = [1, 1]} : vector<16x96xf32> to vector<16x8xf32>
    %57 = vector.extract_strided_slice %55 {offsets = [0, 8], sizes = [16, 8], strides = [1, 1]} : vector<16x96xf32> to vector<16x8xf32>
    %58 = vector.extract_strided_slice %55 {offsets = [0, 16], sizes = [16, 8], strides = [1, 1]} : vector<16x96xf32> to vector<16x8xf32>
    %59 = vector.extract_strided_slice %55 {offsets = [0, 24], sizes = [16, 8], strides = [1, 1]} : vector<16x96xf32> to vector<16x8xf32>
    %60 = vector.shape_cast %56 : vector<16x8xf32> to vector<1x16x8xf32>
    %61 = vector.shape_cast %57 : vector<16x8xf32> to vector<1x16x8xf32>
    %62 = vector.shape_cast %58 : vector<16x8xf32> to vector<1x16x8xf32>
    %63 = vector.shape_cast %59 : vector<16x8xf32> to vector<1x16x8xf32>
    %64 = tpu.concatenate %60, %61, %62, %63 in 0 : vector<1x16x8xf32>, vector<1x16x8xf32>, vector<1x16x8xf32>, vector<1x16x8xf32> -> vector<4x16x8xf32>
    %65 = vector.extract_strided_slice %55 {offsets = [0, 32], sizes = [16, 8], strides = [1, 1]} : vector<16x96xf32> to vector<16x8xf32>
    %66 = vector.extract_strided_slice %55 {offsets = [0, 40], sizes = [16, 8], strides = [1, 1]} : vector<16x96xf32> to vector<16x8xf32>
    %67 = vector.extract_strided_slice %55 {offsets = [0, 48], sizes = [16, 8], strides = [1, 1]} : vector<16x96xf32> to vector<16x8xf32>
    %68 = vector.extract_strided_slice %55 {offsets = [0, 56], sizes = [16, 8], strides = [1, 1]} : vector<16x96xf32> to vector<16x8xf32>
    %69 = vector.shape_cast %65 : vector<16x8xf32> to vector<1x16x8xf32>
    %70 = vector.shape_cast %66 : vector<16x8xf32> to vector<1x16x8xf32>
    %71 = vector.shape_cast %67 : vector<16x8xf32> to vector<1x16x8xf32>
    %72 = vector.shape_cast %68 : vector<16x8xf32> to vector<1x16x8xf32>
    %73 = tpu.concatenate %69, %70, %71, %72 in 0 : vector<1x16x8xf32>, vector<1x16x8xf32>, vector<1x16x8xf32>, vector<1x16x8xf32> -> vector<4x16x8xf32>
    %74 = vector.extract_strided_slice %55 {offsets = [0, 64], sizes = [16, 8], strides = [1, 1]} : vector<16x96xf32> to vector<16x8xf32>
    %75 = vector.extract_strided_slice %55 {offsets = [0, 72], sizes = [16, 8], strides = [1, 1]} : vector<16x96xf32> to vector<16x8xf32>
    %76 = vector.extract_strided_slice %55 {offsets = [0, 80], sizes = [16, 8], strides = [1, 1]} : vector<16x96xf32> to vector<16x8xf32>
    %77 = vector.extract_strided_slice %55 {offsets = [0, 88], sizes = [16, 8], strides = [1, 1]} : vector<16x96xf32> to vector<16x8xf32>
    %78 = vector.shape_cast %74 : vector<16x8xf32> to vector<1x16x8xf32>
    %79 = vector.shape_cast %75 : vector<16x8xf32> to vector<1x16x8xf32>
    %80 = vector.shape_cast %76 : vector<16x8xf32> to vector<1x16x8xf32>
    %81 = vector.shape_cast %77 : vector<16x8xf32> to vector<1x16x8xf32>
    %82 = tpu.concatenate %78, %79, %80, %81 in 0 : vector<1x16x8xf32>, vector<1x16x8xf32>, vector<1x16x8xf32>, vector<1x16x8xf32> -> vector<4x16x8xf32>
    %cst_26 = arith.constant dense<0.000000e+00> : vector<4x16x16xf32>
    %83 = tpu.matmul %64, %73, %cst_26 {dimension_numbers = #tpu.dot_dimension_numbers<[2], [2], [1], [1], [0, 0, 0, 1, 1, 1], [0], [0]>} : vector<4x16x8xf32>, vector<4x16x8xf32>, vector<4x16x16xf32> -> vector<4x16x16xf32>
    %84 = vector.shape_cast %25 : vector<16x16xf32> to vector<1x16x16xf32>
    %85 = vector.broadcast %84 : vector<1x16x16xf32> to vector<4x16x16xf32>
    %86 = arith.addf %83, %85 : vector<4x16x16xf32>
    %cst_27 = arith.constant dense<0xFF800000> : vector<4x16xf32>
    %87 = vector.multi_reduction <maximumf>, %86, %cst_27 [2] : vector<4x16x16xf32> to vector<4x16xf32>
    %88 = vector.shape_cast %87 : vector<4x16xf32> to vector<4x16x1xf32>
    %89 = vector.broadcast %88 : vector<4x16x1xf32> to vector<4x16x16xf32>
    %90 = arith.subf %86, %89 : vector<4x16x16xf32>
    %91 = math.exp %90 : vector<4x16x16xf32>
    %cst_28 = arith.constant dense<0.000000e+00> : vector<4x16xf32>
    %92 = vector.multi_reduction <add>, %91, %cst_28 [2] : vector<4x16x16xf32> to vector<4x16xf32>
    %93 = vector.shape_cast %92 : vector<4x16xf32> to vector<4x16x1xf32>
    %94 = tpu.reciprocal %93 {approx = true} : vector<4x16x1xf32> -> vector<4x16x1xf32>
    %95 = vector.broadcast %94 : vector<4x16x1xf32> to vector<4x16x16xf32>
    %96 = arith.mulf %91, %95 : vector<4x16x16xf32>
    %cst_29 = arith.constant dense<0.000000e+00> : vector<4x16x8xf32>
    %97 = tpu.matmul %96, %82, %cst_29 {dimension_numbers = #tpu.dot_dimension_numbers<[2], [1], [1], [2], [0, 0, 0, 1, 1, 2], [0], [0]>} : vector<4x16x16xf32>, vector<4x16x8xf32>, vector<4x16x8xf32> -> vector<4x16x8xf32>
    %cst_30 = arith.constant dense<0.000000e+00> : vector<4x16x32xf32>
    %98 = tpu.matmul %97, %34, %cst_30 {dimension_numbers = #tpu.dot_dimension_numbers<[2], [1], [1], [2], [0, 0, 0, 1, 1, 2], [0], [0]>} : vector<4x16x8xf32>, vector<4x8x32xf32>, vector<4x16x32xf32> -> vector<4x16x32xf32>
    %cst_31 = arith.constant dense<0.000000e+00> : vector<16x32xf32>
    %99 = vector.multi_reduction <add>, %98, %cst_31 [0] : vector<4x16x32xf32> to vector<16x32xf32>
    %100 = vector.broadcast %38 : vector<1x32xf32> to vector<16x32xf32>
    %101 = arith.addf %99, %100 : vector<16x32xf32>
    %102 = arith.addf %24, %101 : vector<16x32xf32>
    %cst_32 = arith.constant dense<0.000000e+00> : vector<16xf32>
    %103 = vector.multi_reduction <add>, %102, %cst_32 [1] : vector<16x32xf32> to vector<16xf32>
    %104 = vector.shape_cast %103 : vector<16xf32> to vector<16x1xf32>
    %cst_33 = arith.constant 3.200000e+01 : f32
    %105 = vector.broadcast %cst_33 : f32 to vector<16x1xf32>
    %106 = arith.divf %104, %105 : vector<16x1xf32>
    %107 = vector.broadcast %106 : vector<16x1xf32> to vector<16x32xf32>
    %108 = arith.subf %102, %107 : vector<16x32xf32>
    %109 = arith.mulf %108, %108 : vector<16x32xf32>
    %cst_34 = arith.constant dense<0.000000e+00> : vector<16xf32>
    %110 = vector.multi_reduction <add>, %109, %cst_34 [1] : vector<16x32xf32> to vector<16xf32>
    %111 = vector.shape_cast %110 : vector<16xf32> to vector<16x1xf32>
    %cst_35 = arith.constant 3.200000e+01 : f32
    %112 = vector.broadcast %cst_35 : f32 to vector<16x1xf32>
    %113 = arith.divf %111, %112 : vector<16x1xf32>
    %114 = vector.broadcast %106 : vector<16x1xf32> to vector<16x32xf32>
    %115 = arith.subf %102, %114 : vector<16x32xf32>
    %cst_36 = arith.constant 9.99999996E-13 : f32
    %116 = vector.broadcast %cst_36 : f32 to vector<16x1xf32>
    %117 = arith.addf %113, %116 : vector<16x1xf32>
    %118 = math.rsqrt %117 : vector<16x1xf32>
    %119 = vector.broadcast %118 : vector<16x1xf32> to vector<16x32xf32>
    %120 = arith.mulf %115, %119 : vector<16x32xf32>
    %121 = vector.broadcast %39 : vector<1x32xf32> to vector<16x32xf32>
    %122 = arith.mulf %120, %121 : vector<16x32xf32>
    %123 = vector.broadcast %40 : vector<1x32xf32> to vector<16x32xf32>
    %124 = arith.addf %122, %123 : vector<16x32xf32>
    %cst_37 = arith.constant dense<0.000000e+00> : vector<16x128xf32>
    %125 = tpu.matmul %124, %46, %cst_37 {dimension_numbers = #tpu.dot_dimension_numbers<[1], [0], [0], [1], [0, 0, 1, 1], [], []>} : vector<16x32xf32>, vector<32x128xf32>, vector<16x128xf32> -> vector<16x128xf32>
    %126 = vector.broadcast %49 : vector<1x128xf32> to vector<16x128xf32>
    %127 = arith.addf %125, %126 : vector<16x128xf32>
    %cst_38 = arith.constant 5.000000e-01 : f32
    %128 = vector.broadcast %cst_38 : f32 to vector<16x128xf32>
    %129 = arith.mulf %128, %127 : vector<16x128xf32>
    %cst_39 = arith.constant 4.471500e-02 : f32
    %130 = vector.broadcast %cst_39 : f32 to vector<16x128xf32>
    %131 = arith.mulf %130, %127 : vector<16x128xf32>
    %132 = arith.mulf %131, %127 : vector<16x128xf32>
    %133 = arith.mulf %132, %127 : vector<16x128xf32>
    %134 = arith.addf %127, %133 : vector<16x128xf32>
    %cst_40 = arith.constant 0.797884583 : f32
    %135 = vector.broadcast %cst_40 : f32 to vector<16x128xf32>
    %136 = arith.mulf %135, %134 : vector<16x128xf32>
    %137 = math.tanh %136 : vector<16x128xf32>
    %cst_41 = arith.constant 1.000000e+00 : f32
    %138 = vector.broadcast %cst_41 : f32 to vector<16x128xf32>
    %139 = arith.addf %138, %137 : vector<16x128xf32>
    %140 = arith.mulf %129, %139 : vector<16x128xf32>
    %cst_42 = arith.constant dense<0.000000e+00> : vector<16x32xf32>
    %141 = tpu.matmul %140, %52, %cst_42 {dimension_numbers = #tpu.dot_dimension_numbers<[1], [0], [0], [1], [0, 0, 1, 1], [], []>} : vector<16x128xf32>, vector<128x32xf32>, vector<16x32xf32> -> vector<16x32xf32>
    %142 = vector.broadcast %41 : vector<1x32xf32> to vector<16x32xf32>
    %143 = arith.addf %141, %142 : vector<16x32xf32>
    %144 = arith.addf %124, %143 : vector<16x32xf32>
    %cst_43 = arith.constant dense<0.000000e+00> : vector<16xf32>
    %145 = vector.multi_reduction <add>, %144, %cst_43 [1] : vector<16x32xf32> to vector<16xf32>
    %146 = vector.shape_cast %145 : vector<16xf32> to vector<16x1xf32>
    %cst_44 = arith.constant 3.200000e+01 : f32
    %147 = vector.broadcast %cst_44 : f32 to vector<16x1xf32>
    %148 = arith.divf %146, %147 : vector<16x1xf32>
    %149 = vector.broadcast %148 : vector<16x1xf32> to vector<16x32xf32>
    %150 = arith.subf %144, %149 : vector<16x32xf32>
    %151 = arith.mulf %150, %150 : vector<16x32xf32>
    %cst_45 = arith.constant dense<0.000000e+00> : vector<16xf32>
    %152 = vector.multi_reduction <add>, %151, %cst_45 [1] : vector<16x32xf32> to vector<16xf32>
    %153 = vector.shape_cast %152 : vector<16xf32> to vector<16x1xf32>
    %cst_46 = arith.constant 3.200000e+01 : f32
    %154 = vector.broadcast %cst_46 : f32 to vector<16x1xf32>
    %155 = arith.divf %153, %154 : vector<16x1xf32>
    %156 = vector.broadcast %148 : vector<16x1xf32> to vector<16x32xf32>
    %157 = arith.subf %144, %156 : vector<16x32xf32>
    %cst_47 = arith.constant 9.99999996E-13 : f32
    %158 = vector.broadcast %cst_47 : f32 to vector<16x1xf32>
    %159 = arith.addf %155, %158 : vector<16x1xf32>
    %160 = math.rsqrt %159 : vector<16x1xf32>
    %161 = vector.broadcast %160 : vector<16x1xf32> to vector<16x32xf32>
    %162 = arith.mulf %157, %161 : vector<16x32xf32>
    %163 = vector.broadcast %42 : vector<1x32xf32> to vector<16x32xf32>
    %164 = arith.mulf %162, %163 : vector<16x32xf32>
    %165 = vector.broadcast %43 : vector<1x32xf32> to vector<16x32xf32>
    %166 = arith.addf %164, %165 : vector<16x32xf32>
    %c1_i32 = arith.constant 1 : i32
    %167 = arith.index_cast %c1_i32 : i32 to index
    %c0_48 = arith.constant 0 : index
    %c0_49 = arith.constant 0 : index
    %168 = vector.load %arg4[%167, %c0_48, %c0_49] : memref<2x32x96xf32, #tpu.memory_space<vmem>>, vector<1x32x96xf32>
    %169 = vector.shape_cast %168 : vector<1x32x96xf32> to vector<32x96xf32>
    %170 = arith.index_cast %c1_i32 : i32 to index
    %c0_50 = arith.constant 0 : index
    %c0_51 = arith.constant 0 : index
    %171 = vector.load %arg5[%170, %c0_50, %c0_51] : memref<2x1x96xf32, #tpu.memory_space<vmem>>, vector<1x1x96xf32>
    %172 = vector.shape_cast %171 : vector<1x1x96xf32> to vector<1x96xf32>
    %173 = arith.index_cast %c1_i32 : i32 to index
    %c0_52 = arith.constant 0 : index
    %c0_53 = arith.constant 0 : index
    %c0_54 = arith.constant 0 : index
    %174 = vector.load %arg6[%173, %c0_52, %c0_53, %c0_54] : memref<2x4x8x32xf32, #tpu.memory_space<vmem>>, vector<1x4x8x32xf32>
    %175 = vector.shape_cast %174 : vector<1x4x8x32xf32> to vector<4x8x32xf32>
    %176 = arith.index_cast %c1_i32 : i32 to index
    %c0_55 = arith.constant 0 : index
    %c0_56 = arith.constant 0 : index
    %177 = vector.load %arg7[%176, %c0_55, %c0_56] : memref<2x6x32xf32, #tpu.memory_space<vmem>>, vector<1x6x32xf32>
    %178 = vector.shape_cast %177 : vector<1x6x32xf32> to vector<6x32xf32>
    %179 = vector.extract_strided_slice %178 {offsets = [0, 0], sizes = [1, 32], strides = [1, 1]} : vector<6x32xf32> to vector<1x32xf32>
    %180 = vector.extract_strided_slice %178 {offsets = [1, 0], sizes = [1, 32], strides = [1, 1]} : vector<6x32xf32> to vector<1x32xf32>
    %181 = vector.extract_strided_slice %178 {offsets = [2, 0], sizes = [1, 32], strides = [1, 1]} : vector<6x32xf32> to vector<1x32xf32>
    %182 = vector.extract_strided_slice %178 {offsets = [3, 0], sizes = [1, 32], strides = [1, 1]} : vector<6x32xf32> to vector<1x32xf32>
    %183 = vector.extract_strided_slice %178 {offsets = [4, 0], sizes = [1, 32], strides = [1, 1]} : vector<6x32xf32> to vector<1x32xf32>
    %184 = vector.extract_strided_slice %178 {offsets = [5, 0], sizes = [1, 32], strides = [1, 1]} : vector<6x32xf32> to vector<1x32xf32>
    %185 = arith.index_cast %c1_i32 : i32 to index
    %c0_57 = arith.constant 0 : index
    %c0_58 = arith.constant 0 : index
    %186 = vector.load %arg8[%185, %c0_57, %c0_58] : memref<2x32x128xf32, #tpu.memory_space<vmem>>, vector<1x32x128xf32>
    %187 = vector.shape_cast %186 : vector<1x32x128xf32> to vector<32x128xf32>
    %188 = arith.index_cast %c1_i32 : i32 to index
    %c0_59 = arith.constant 0 : index
    %c0_60 = arith.constant 0 : index
    %189 = vector.load %arg9[%188, %c0_59, %c0_60] : memref<2x1x128xf32, #tpu.memory_space<vmem>>, vector<1x1x128xf32>
    %190 = vector.shape_cast %189 : vector<1x1x128xf32> to vector<1x128xf32>
    %191 = arith.index_cast %c1_i32 : i32 to index
    %c0_61 = arith.constant 0 : index
    %c0_62 = arith.constant 0 : index
    %192 = vector.load %arg10[%191, %c0_61, %c0_62] : memref<2x128x32xf32, #tpu.memory_space<vmem>>, vector<1x128x32xf32>
    %193 = vector.shape_cast %192 : vector<1x128x32xf32> to vector<128x32xf32>
    %cst_63 = arith.constant dense<0.000000e+00> : vector<16x96xf32>
    %194 = tpu.matmul %166, %169, %cst_63 {dimension_numbers = #tpu.dot_dimension_numbers<[1], [0], [0], [1], [0, 0, 1, 1], [], []>} : vector<16x32xf32>, vector<32x96xf32>, vector<16x96xf32> -> vector<16x96xf32>
    %195 = vector.broadcast %172 : vector<1x96xf32> to vector<16x96xf32>
    %196 = arith.addf %194, %195 : vector<16x96xf32>
    %197 = vector.extract_strided_slice %196 {offsets = [0, 0], sizes = [16, 8], strides = [1, 1]} : vector<16x96xf32> to vector<16x8xf32>
    %198 = vector.extract_strided_slice %196 {offsets = [0, 8], sizes = [16, 8], strides = [1, 1]} : vector<16x96xf32> to vector<16x8xf32>
    %199 = vector.extract_strided_slice %196 {offsets = [0, 16], sizes = [16, 8], strides = [1, 1]} : vector<16x96xf32> to vector<16x8xf32>
    %200 = vector.extract_strided_slice %196 {offsets = [0, 24], sizes = [16, 8], strides = [1, 1]} : vector<16x96xf32> to vector<16x8xf32>
    %201 = vector.shape_cast %197 : vector<16x8xf32> to vector<1x16x8xf32>
    %202 = vector.shape_cast %198 : vector<16x8xf32> to vector<1x16x8xf32>
    %203 = vector.shape_cast %199 : vector<16x8xf32> to vector<1x16x8xf32>
    %204 = vector.shape_cast %200 : vector<16x8xf32> to vector<1x16x8xf32>
    %205 = tpu.concatenate %201, %202, %203, %204 in 0 : vector<1x16x8xf32>, vector<1x16x8xf32>, vector<1x16x8xf32>, vector<1x16x8xf32> -> vector<4x16x8xf32>
    %206 = vector.extract_strided_slice %196 {offsets = [0, 32], sizes = [16, 8], strides = [1, 1]} : vector<16x96xf32> to vector<16x8xf32>
    %207 = vector.extract_strided_slice %196 {offsets = [0, 40], sizes = [16, 8], strides = [1, 1]} : vector<16x96xf32> to vector<16x8xf32>
    %208 = vector.extract_strided_slice %196 {offsets = [0, 48], sizes = [16, 8], strides = [1, 1]} : vector<16x96xf32> to vector<16x8xf32>
    %209 = vector.extract_strided_slice %196 {offsets = [0, 56], sizes = [16, 8], strides = [1, 1]} : vector<16x96xf32> to vector<16x8xf32>
    %210 = vector.shape_cast %206 : vector<16x8xf32> to vector<1x16x8xf32>
    %211 = vector.shape_cast %207 : vector<16x8xf32> to vector<1x16x8xf32>
    %212 = vector.shape_cast %208 : vector<16x8xf32> to vector<1x16x8xf32>
    %213 = vector.shape_cast %209 : vector<16x8xf32> to vector<1x16x8xf32>
    %214 = tpu.concatenate %210, %211, %212, %213 in 0 : vector<1x16x8xf32>, vector<1x16x8xf32>, vector<1x16x8xf32>, vector<1x16x8xf32> -> vector<4x16x8xf32>
    %215 = vector.extract_strided_slice %196 {offsets = [0, 64], sizes = [16, 8], strides = [1, 1]} : vector<16x96xf32> to vector<16x8xf32>
    %216 = vector.extract_strided_slice %196 {offsets = [0, 72], sizes = [16, 8], strides = [1, 1]} : vector<16x96xf32> to vector<16x8xf32>
    %217 = vector.extract_strided_slice %196 {offsets = [0, 80], sizes = [16, 8], strides = [1, 1]} : vector<16x96xf32> to vector<16x8xf32>
    %218 = vector.extract_strided_slice %196 {offsets = [0, 88], sizes = [16, 8], strides = [1, 1]} : vector<16x96xf32> to vector<16x8xf32>
    %219 = vector.shape_cast %215 : vector<16x8xf32> to vector<1x16x8xf32>
    %220 = vector.shape_cast %216 : vector<16x8xf32> to vector<1x16x8xf32>
    %221 = vector.shape_cast %217 : vector<16x8xf32> to vector<1x16x8xf32>
    %222 = vector.shape_cast %218 : vector<16x8xf32> to vector<1x16x8xf32>
    %223 = tpu.concatenate %219, %220, %221, %222 in 0 : vector<1x16x8xf32>, vector<1x16x8xf32>, vector<1x16x8xf32>, vector<1x16x8xf32> -> vector<4x16x8xf32>
    %cst_64 = arith.constant dense<0.000000e+00> : vector<4x16x16xf32>
    %224 = tpu.matmul %205, %214, %cst_64 {dimension_numbers = #tpu.dot_dimension_numbers<[2], [2], [1], [1], [0, 0, 0, 1, 1, 1], [0], [0]>} : vector<4x16x8xf32>, vector<4x16x8xf32>, vector<4x16x16xf32> -> vector<4x16x16xf32>
    %225 = vector.shape_cast %25 : vector<16x16xf32> to vector<1x16x16xf32>
    %226 = vector.broadcast %225 : vector<1x16x16xf32> to vector<4x16x16xf32>
    %227 = arith.addf %224, %226 : vector<4x16x16xf32>
    %cst_65 = arith.constant dense<0xFF800000> : vector<4x16xf32>
    %228 = vector.multi_reduction <maximumf>, %227, %cst_65 [2] : vector<4x16x16xf32> to vector<4x16xf32>
    %229 = vector.shape_cast %228 : vector<4x16xf32> to vector<4x16x1xf32>
    %230 = vector.broadcast %229 : vector<4x16x1xf32> to vector<4x16x16xf32>
    %231 = arith.subf %227, %230 : vector<4x16x16xf32>
    %232 = math.exp %231 : vector<4x16x16xf32>
    %cst_66 = arith.constant dense<0.000000e+00> : vector<4x16xf32>
    %233 = vector.multi_reduction <add>, %232, %cst_66 [2] : vector<4x16x16xf32> to vector<4x16xf32>
    %234 = vector.shape_cast %233 : vector<4x16xf32> to vector<4x16x1xf32>
    %235 = tpu.reciprocal %234 {approx = true} : vector<4x16x1xf32> -> vector<4x16x1xf32>
    %236 = vector.broadcast %235 : vector<4x16x1xf32> to vector<4x16x16xf32>
    %237 = arith.mulf %232, %236 : vector<4x16x16xf32>
    %cst_67 = arith.constant dense<0.000000e+00> : vector<4x16x8xf32>
    %238 = tpu.matmul %237, %223, %cst_67 {dimension_numbers = #tpu.dot_dimension_numbers<[2], [1], [1], [2], [0, 0, 0, 1, 1, 2], [0], [0]>} : vector<4x16x16xf32>, vector<4x16x8xf32>, vector<4x16x8xf32> -> vector<4x16x8xf32>
    %cst_68 = arith.constant dense<0.000000e+00> : vector<4x16x32xf32>
    %239 = tpu.matmul %238, %175, %cst_68 {dimension_numbers = #tpu.dot_dimension_numbers<[2], [1], [1], [2], [0, 0, 0, 1, 1, 2], [0], [0]>} : vector<4x16x8xf32>, vector<4x8x32xf32>, vector<4x16x32xf32> -> vector<4x16x32xf32>
    %cst_69 = arith.constant dense<0.000000e+00> : vector<16x32xf32>
    %240 = vector.multi_reduction <add>, %239, %cst_69 [0] : vector<4x16x32xf32> to vector<16x32xf32>
    %241 = vector.broadcast %179 : vector<1x32xf32> to vector<16x32xf32>
    %242 = arith.addf %240, %241 : vector<16x32xf32>
    %243 = arith.addf %166, %242 : vector<16x32xf32>
    %cst_70 = arith.constant dense<0.000000e+00> : vector<16xf32>
    %244 = vector.multi_reduction <add>, %243, %cst_70 [1] : vector<16x32xf32> to vector<16xf32>
    %245 = vector.shape_cast %244 : vector<16xf32> to vector<16x1xf32>
    %cst_71 = arith.constant 3.200000e+01 : f32
    %246 = vector.broadcast %cst_71 : f32 to vector<16x1xf32>
    %247 = arith.divf %245, %246 : vector<16x1xf32>
    %248 = vector.broadcast %247 : vector<16x1xf32> to vector<16x32xf32>
    %249 = arith.subf %243, %248 : vector<16x32xf32>
    %250 = arith.mulf %249, %249 : vector<16x32xf32>
    %cst_72 = arith.constant dense<0.000000e+00> : vector<16xf32>
    %251 = vector.multi_reduction <add>, %250, %cst_72 [1] : vector<16x32xf32> to vector<16xf32>
    %252 = vector.shape_cast %251 : vector<16xf32> to vector<16x1xf32>
    %cst_73 = arith.constant 3.200000e+01 : f32
    %253 = vector.broadcast %cst_73 : f32 to vector<16x1xf32>
    %254 = arith.divf %252, %253 : vector<16x1xf32>
    %255 = vector.broadcast %247 : vector<16x1xf32> to vector<16x32xf32>
    %256 = arith.subf %243, %255 : vector<16x32xf32>
    %cst_74 = arith.constant 9.99999996E-13 : f32
    %257 = vector.broadcast %cst_74 : f32 to vector<16x1xf32>
    %258 = arith.addf %254, %257 : vector<16x1xf32>
    %259 = math.rsqrt %258 : vector<16x1xf32>
    %260 = vector.broadcast %259 : vector<16x1xf32> to vector<16x32xf32>
    %261 = arith.mulf %256, %260 : vector<16x32xf32>
    %262 = vector.broadcast %180 : vector<1x32xf32> to vector<16x32xf32>
    %263 = arith.mulf %261, %262 : vector<16x32xf32>
    %264 = vector.broadcast %181 : vector<1x32xf32> to vector<16x32xf32>
    %265 = arith.addf %263, %264 : vector<16x32xf32>
    %cst_75 = arith.constant dense<0.000000e+00> : vector<16x128xf32>
    %266 = tpu.matmul %265, %187, %cst_75 {dimension_numbers = #tpu.dot_dimension_numbers<[1], [0], [0], [1], [0, 0, 1, 1], [], []>} : vector<16x32xf32>, vector<32x128xf32>, vector<16x128xf32> -> vector<16x128xf32>
    %267 = vector.broadcast %190 : vector<1x128xf32> to vector<16x128xf32>
    %268 = arith.addf %266, %267 : vector<16x128xf32>
    %cst_76 = arith.constant 5.000000e-01 : f32
    %269 = vector.broadcast %cst_76 : f32 to vector<16x128xf32>
    %270 = arith.mulf %269, %268 : vector<16x128xf32>
    %cst_77 = arith.constant 4.471500e-02 : f32
    %271 = vector.broadcast %cst_77 : f32 to vector<16x128xf32>
    %272 = arith.mulf %271, %268 : vector<16x128xf32>
    %273 = arith.mulf %272, %268 : vector<16x128xf32>
    %274 = arith.mulf %273, %268 : vector<16x128xf32>
    %275 = arith.addf %268, %274 : vector<16x128xf32>
    %cst_78 = arith.constant 0.797884583 : f32
    %276 = vector.broadcast %cst_78 : f32 to vector<16x128xf32>
    %277 = arith.mulf %276, %275 : vector<16x128xf32>
    %278 = math.tanh %277 : vector<16x128xf32>
    %cst_79 = arith.constant 1.000000e+00 : f32
    %279 = vector.broadcast %cst_79 : f32 to vector<16x128xf32>
    %280 = arith.addf %279, %278 : vector<16x128xf32>
    %281 = arith.mulf %270, %280 : vector<16x128xf32>
    %cst_80 = arith.constant dense<0.000000e+00> : vector<16x32xf32>
    %282 = tpu.matmul %281, %193, %cst_80 {dimension_numbers = #tpu.dot_dimension_numbers<[1], [0], [0], [1], [0, 0, 1, 1], [], []>} : vector<16x128xf32>, vector<128x32xf32>, vector<16x32xf32> -> vector<16x32xf32>
    %283 = vector.broadcast %182 : vector<1x32xf32> to vector<16x32xf32>
    %284 = arith.addf %282, %283 : vector<16x32xf32>
    %285 = arith.addf %265, %284 : vector<16x32xf32>
    %cst_81 = arith.constant dense<0.000000e+00> : vector<16xf32>
    %286 = vector.multi_reduction <add>, %285, %cst_81 [1] : vector<16x32xf32> to vector<16xf32>
    %287 = vector.shape_cast %286 : vector<16xf32> to vector<16x1xf32>
    %cst_82 = arith.constant 3.200000e+01 : f32
    %288 = vector.broadcast %cst_82 : f32 to vector<16x1xf32>
    %289 = arith.divf %287, %288 : vector<16x1xf32>
    %290 = vector.broadcast %289 : vector<16x1xf32> to vector<16x32xf32>
    %291 = arith.subf %285, %290 : vector<16x32xf32>
    %292 = arith.mulf %291, %291 : vector<16x32xf32>
    %cst_83 = arith.constant dense<0.000000e+00> : vector<16xf32>
    %293 = vector.multi_reduction <add>, %292, %cst_83 [1] : vector<16x32xf32> to vector<16xf32>
    %294 = vector.shape_cast %293 : vector<16xf32> to vector<16x1xf32>
    %cst_84 = arith.constant 3.200000e+01 : f32
    %295 = vector.broadcast %cst_84 : f32 to vector<16x1xf32>
    %296 = arith.divf %294, %295 : vector<16x1xf32>
    %297 = vector.broadcast %289 : vector<16x1xf32> to vector<16x32xf32>
    %298 = arith.subf %285, %297 : vector<16x32xf32>
    %cst_85 = arith.constant 9.99999996E-13 : f32
    %299 = vector.broadcast %cst_85 : f32 to vector<16x1xf32>
    %300 = arith.addf %296, %299 : vector<16x1xf32>
    %301 = math.rsqrt %300 : vector<16x1xf32>
    %302 = vector.broadcast %301 : vector<16x1xf32> to vector<16x32xf32>
    %303 = arith.mulf %298, %302 : vector<16x32xf32>
    %304 = vector.broadcast %183 : vector<1x32xf32> to vector<16x32xf32>
    %305 = arith.mulf %303, %304 : vector<16x32xf32>
    %306 = vector.broadcast %184 : vector<1x32xf32> to vector<16x32xf32>
    %307 = arith.addf %305, %306 : vector<16x32xf32>
    %c2_i32 = arith.constant 2 : i32
    %c0_86 = arith.constant 0 : index
    %c0_87 = arith.constant 0 : index
    %308 = vector.load %arg11[%c0_86, %c0_87] : memref<32x1xf32, #tpu.memory_space<vmem>>, vector<32x1xf32>
    %cst_88 = arith.constant dense<0.000000e+00> : vector<16x1xf32>
    %309 = tpu.matmul %307, %308, %cst_88 {dimension_numbers = #tpu.dot_dimension_numbers<[1], [0], [0], [1], [0, 0, 1, 1], [], []>} : vector<16x32xf32>, vector<32x1xf32>, vector<16x1xf32> -> vector<16x1xf32>
    %310 = tpu.iota {dimensions = array<i32: 1>} : vector<2x16xi32>
    %311 = tpu.iota {dimensions = array<i32: 0>} : vector<2x16xi32>
    %c8_i32 = arith.constant 8 : i32
    %312 = vector.broadcast %c8_i32 : i32 to vector<2x16xi32>
    %313 = arith.muli %311, %312 : vector<2x16xi32>
    %314 = arith.cmpi eq, %310, %313 : vector<2x16xi32>
    %315 = arith.extui %314 : vector<2x16xi1> to vector<2x16xi32>
    %316 = arith.sitofp %315 : vector<2x16xi32> to vector<2x16xf32>
    %cst_89 = arith.constant dense<0.000000e+00> : vector<2x1xf32>
    %317 = tpu.matmul %316, %309, %cst_89 {dimension_numbers = #tpu.dot_dimension_numbers<[1], [0], [0], [1], [0, 0, 1, 1], [], []>} : vector<2x16xf32>, vector<16x1xf32>, vector<2x1xf32> -> vector<2x1xf32>
    %c0_90 = arith.constant 0 : index
    %c0_91 = arith.constant 0 : index
    %318 = vector.load %arg12[%c0_90, %c0_91] : memref<1x1xf32, #tpu.memory_space<vmem>>, vector<1x1xf32>
    %319 = vector.broadcast %318 : vector<1x1xf32> to vector<2x1xf32>
    %320 = arith.addf %317, %319 : vector<2x1xf32>
    %c0_92 = arith.constant 0 : index
    %c0_93 = arith.constant 0 : index
    %321 = vector.load %arg13[%c0_92, %c0_93] : memref<2x1xf32, #tpu.memory_space<vmem>>, vector<2x1xf32>
    tpu.vector_store %arg13[%c0_92, %c0_93], %320 {strides = array<i32>} : memref<2x1xf32, #tpu.memory_space<vmem>>, vector<2x1xf32>,
    %c0_94 = arith.constant 0 : index
    %c0_95 = arith.constant 0 : index
    %322 = vector.load %arg2[%c0_94, %c0_95] : memref<2x1xf32, #tpu.memory_space<vmem>>, vector<2x1xf32>
    %cst_96 = arith.constant 0.000000e+00 : f32
    %323 = vector.broadcast %cst_96 : f32 to vector<2x1xf32>
    %324 = arith.maximumf %320, %323 : vector<2x1xf32>
    %325 = arith.mulf %320, %322 : vector<2x1xf32>
    %326 = arith.subf %324, %325 : vector<2x1xf32>
    %327 = math.absf %320 : vector<2x1xf32>
    %cst_97 = arith.constant 0.000000e+00 : f32
    %328 = vector.broadcast %cst_97 : f32 to vector<2x1xf32>
    %329 = arith.subf %328, %327 : vector<2x1xf32>
    %330 = math.exp %329 : vector<2x1xf32>
    %cst_98 = arith.constant 1.000000e+00 : f32
    %331 = vector.broadcast %cst_98 : f32 to vector<2x1xf32>
    %332 = arith.addf %331, %330 : vector<2x1xf32>
    %333 = math.log %332 : vector<2x1xf32>
    %334 = arith.addf %326, %333 : vector<2x1xf32>
    %cst_99 = arith.constant dense<0.000000e+00> : vector<1xf32>
    %335 = vector.multi_reduction <add>, %334, %cst_99 [0] : vector<2x1xf32> to vector<1xf32>
    %336 = vector.shape_cast %335 : vector<1xf32> to vector<1x1xf32>
    %cst_100 = arith.constant 5.000000e-01 : f32
    %337 = vector.broadcast %cst_100 : f32 to vector<1x1xf32>
    %338 = arith.mulf %336, %337 : vector<1x1xf32>
    %c0_101 = arith.constant 0 : index
    %c0_102 = arith.constant 0 : index
    %339 = vector.load %arg14[%c0_101, %c0_102] : memref<1x1xf32, #tpu.memory_space<vmem>>, vector<1x1xf32>
    tpu.vector_store %arg14[%c0_101, %c0_102], %338 {strides = array<i32>} : memref<1x1xf32, #tpu.memory_space<vmem>>, vector<1x1xf32>,
    return
  }
}

</mosaic_0001>

<bundles_post_ra>
// kernel: tpu_custom_call.1
= control target key start
LH: loop header
LB: loop body
LE: loop exit
PB: predicated region body
PF: predicated region fallthrough
CT: control target
= control target key end

     0   :  { %s5009_s0 = inlined_call_operand.vmem [shape: f32[16,32], index: 0, kind: input, shape index: {}]   ;;  %s5010_s1 = inlined_call_operand.vmem [shape: f32[16,16], index: 1, kind: input, shape index: {}]   ;;  %s5011_s2 = inlined_call_operand.vmem [shape: f32[2,1], index: 2, kind: input, shape index: {}]   ;;  %s5012_s3 = inlined_call_operand.vmem [shape: f32[2,32], index: 3, kind: input, shape index: {}]   ;;  %s5013_s4 = inlined_call_operand.vmem [shape: f32[2,32,96], index: 4, kind: input, shape index: {}]   ;;  %s5014_s5 = inlined_call_operand.vmem [shape: f32[2,1,96], index: 5, kind: input, shape index: {}]   ;;  %s5015_s6 = inlined_call_operand.vmem [shape: f32[2,4,8,32], index: 6, kind: input, shape index: {}]   ;;  %s5016_s7 = inlined_call_operand.vmem [shape: f32[2,6,32], index: 7, kind: input, shape index: {}]   ;;  %s5017_s8 = inlined_call_operand.vmem [shape: f32[2,32,128], index: 8, kind: input, shape index: {}]   ;;  %s5018_s9 = inlined_call_operand.vmem [shape: f32[2,1,128], index: 9, kind: input, shape index: {}]   ;;  %s5019_s10 = inlined_call_operand.vmem [shape: f32[2,128,32], index: 10, kind: input, shape index: {}]   ;;  %s5020_s11 = inlined_call_operand.vmem [shape: f32[32,1], index: 11, kind: input, shape index: {}]   ;;  %s5021_s12 = inlined_call_operand.<no memory space> [shape: f32[1,1], index: 12, kind: input, shape index: {}]   ;;  %s5022_s13 = inlined_call_operand.vmem [shape: f32[2,1], index: 13, kind: output, shape index: {0}]   ;;  %s5023_s14 = inlined_call_operand.hbm [shape: f32[1,1], index: 14, kind: output, shape index: {1}]  }
   0x1   :  { %v20_v0 = vstv %s5021_s12 }
   0x2   :  { %21 = vst [vmem:[#allocation2] sm:$0x1] %v20_v0 }
   0x3   :  { %v49_v1 = vld [vmem:[%s5009_s0] sm:$0xff]  ;;  %vm53_vm0 = vcmask 261120   ;;  %v50_v2 = vld [vmem:[%s5009_s0 + $0x8] sm:$0xff] }
   0x4   :  { %22 = vsyncpa [#allocation4], 0  ;;  %v54_v3 = vsel %vm53_vm0, %v49_v1, 0.0  ;;  %v57_v4 = vsel %vm53_vm0, %v50_v2, 0.0  ;;  %v95_v15 = vld [vmem:[%s5013_s4] sm:$0xff]  ;;  %v96_v16 = vld [vmem:[%s5013_s4 + $0x8] sm:$0xff] }
   0x5   :  { %55 = vadd.xlane.f32.xlu0 %v54_v3  ;;  %v97_v17 = vld [vmem:[%s5013_s4 + $0x10] sm:$0xff]  ;;  %v3922_v18 = vpack.c.bf16 %v96_v16, %v95_v15  ;;  %v98_v19 = vld [vmem:[%s5013_s4 + $0x18] sm:$0xff]  ;;  %v3367_v28 = vld [vmem:[%s5012_s3] ss:$0 sm:$0xff]  ;;  %vm231_vm1 = vcmask 64512   ;;  %s4319_s15 = smov 112  }
   0x6   :  { %v3926_v20 = vpack.c.bf16 %v98_v19, %v97_v17  ;;  %v3368_v30 = vld [vmem:[%s5012_s3 + $0x1] ss:$0 sm:$0xff]  ;;  %v3369_v37 = vld [vmem:[%s5014_s5] ss:$0 sm:$0xff]  ;;  %s4318_s3 = smov 120   ;;  %s4320_s16 = smov 104   ;;  %vm4466_vm2 = vmpackc.low %vm231_vm1, %vm231_vm1 }
   0x7   :  { %3923 = vmatprep.subr.bf16.mxu0 %v3922_v18  ;;  %s4321_s17 = smov 96   ;;  %vm576_vm3 = vcmask 130048   ;;  %vm4324_vm4 = vmmov 0   ;;  %vm3325_vm6 = vcmask 1024   ;;  %vm3347_vm7 = vcmask 0  }
   0x8   :  { %3925 = vmatpush3.bf16.msra.mxu0 %v3922_v18 }
   0x9   :  { %58 = vadd.xlane.f32.xlu0 %v57_v4  ;;  %3927 = vmatprep.subr.bf16.mxu0 %v3926_v20 }
   0xc   :  { %3929 = vmatpush3.bf16.msra.mxu0 %v3926_v20 }
  0x92   :  { %v56_v5 = vpop.xlane.xlu0 %55 }
  0x93   :  { %v61_v6 = vmul.f32 0.03125, %v56_v5  ;;  %v4499_v5 = vld [vmem:[%s5010_s1 + $0x8] sm:$0xff] }
  0x95   :  { %v63_v7 = vsub.f32 %v49_v1, %v61_v6  ;;  %v4504_v6 = vld [vmem:[%s5010_s1] sm:$0xff]  ;;  %s4322_s1 = smov 64  }
  0x96   :  { %v59_v8 = vpop.xlane.xlu0 %58 }
  0x97   :  { %v62_v9 = vmul.f32 0.03125, %v59_v8  ;;  %v65_v10 = vmul.f32 %v63_v7, %v63_v7 }
  0x99   :  { %v64_v11 = vsub.f32 %v50_v2, %v62_v9  ;;  %v67_v12 = vsel %vm53_vm0, %v65_v10, 0.0 }
  0x9a   :  { %68 = vadd.xlane.f32.xlu1 %v67_v12 }
  0x9b   :  { %v66_v13 = vmul.f32 %v64_v11, %v64_v11 }
  0x9d   :  { %v70_v14 = vsel %vm53_vm0, %v66_v13, 0.0 }
  0x9e   :  { %71 = vadd.xlane.f32.xlu1 %v70_v14 }
 0x127   :  { %v69_v21 = vpop.xlane.xlu1 %68 }
 0x128   :  { %v73_v22 = vmul.f32 0.03125, %v69_v21 }
 0x12a   :  { %v75_v23 = vadd.f32 1e-12, %v73_v22 }
 0x12b   :  { %v72_v24 = vpop.xlane.xlu1 %71 }
 0x12c   :  { %4198 = vrsqrt.f32 %v75_v23  ;;  %v74_v25 = vmul.f32 0.03125, %v72_v24 }
 0x12e   :  { %v76_v26 = vadd.f32 1e-12, %v74_v25 }
 0x130   :  { %4200 = vrsqrt.f32 %v76_v26 }
 0x136   :  { %v4199_v27 = vpop.eup %4198 }
 0x137   :  { %v79_v29 = vmul.f32 %v4199_v27, %v63_v7 }
 0x139   :  { %v85_v31 = vmul.f32 %v3367_v28, %v79_v29 }
 0x13a   :  { %v4201_v32 = vpop.eup %4200 }
 0x13b   :  { %v80_v33 = vmul.f32 %v4201_v32, %v64_v11  ;;  %v4433_v34 = vadd.f32 %v3368_v30, %v85_v31 }
 0x13d   :  { %v86_v35 = vmul.f32 %v3367_v28, %v80_v33  ;;  %3646 = vmatprep.mubr.msk.f32.mxu0 %vm53_vm0, %v4433_v34 }
 0x13f   :  { %v4437_v36 = vadd.f32 %v3368_v30, %v86_v35 }
 0x141   :  { %3647 = vmatmul.mubr.msk.f32.vlgmr.msra.gmra.mrb[0].mxu0 %vm53_vm0, %v4437_v36 }
 0x214   :  { %v3648_v38 = vpop.f32.mrb[0].mxu0 }
 0x215   :  { %v210_v39 = vadd.f32 %v3648_v38, %v3369_v37  ;;  %v204_v40 = vpop.f32.mrb[1].mxu0 }
 0x216   :  { %v205_v41 = vadd.f32 %v3369_v37, %v204_v40 }
 0x217   :  { %217 = vrot.lane.b32.xlu1 %v210_v39, %s4318_s3 }
 0x218   :  { %215 = vrot.lane.b32.xlu0 %v205_v41, %s4318_s3  ;;  %3653 = vmatprep.mubr.msk.f32.mxu0 %vm231_vm1, %v205_v41  ;;  %v4449_v42 = vpack.i.bf16 %v210_v39, %v205_v41 }
 0x21b   :  { %221 = vrot.lane.b32.xlu1 %v210_v39, %s4319_s15 }
 0x21c   :  { %223 = vrot.lane.b32.xlu0 %v205_v41, %s4320_s16 }
 0x21f   :  { %219 = vrot.lane.b32.xlu1 %v205_v41, %s4319_s15 }
 0x220   :  { %4119 = vrot.lane.b32.xlu0 %v4449_v42, %s4321_s17 }
 0x223   :  { %225 = vrot.lane.b32.xlu1 %v210_v39, %s4320_s16 }
 0x289   :  { %v218_v43 = vpop.permute.xlu1 %217 }
 0x28a   :  { %v216_v44 = vpop.permute.xlu0 %215 }
 0x28b   :  { %v4455_v45 = vpack.i.bf16 %v218_v43, %v216_v44 }
 0x28d   :  { %v222_v46 = vpop.permute.xlu1 %221  ;;  %4124 = vrot.lane.b32.xlu1 %v4455_v45, %s4321_s17 }
 0x28e   :  { %v224_v47 = vpop.permute.xlu0 %223 }
 0x291   :  { %v220_v48 = vpop.permute.xlu1 %219 }
 0x292   :  { %v4459_v49 = vpack.i.bf16 %v222_v46, %v220_v48  ;;  %3667 = vmatprep.mubr.msk.f32.mxu1 %vm231_vm1, %v220_v48  ;;  %v4120_v50 = vpop.permute.xlu0 %4119 }
 0x293   :  { %v4122_v51 = vunpack.i.h.bf16 %v4120_v50  ;;  %v4121_v52 = vunpack.i.l.bf16 %v4120_v50 }
 0x294   :  { %4129 = vrot.lane.b32.xlu0 %v4459_v49, %s4321_s17 }
 0x295   :  { %v3930_v54 = vpack.c.bf16 %v4122_v51, %v4121_v52  ;;  %v226_v55 = vpop.permute.xlu1 %225 }
 0x296   :  { %v4470_v56 = vpack.i.bf16 %v226_v55, %v224_v47 }
 0x297   :  { %3932 = vmatprep.subr.msk.bf16.mxu0 %vm4466_vm2, %v3930_v54 }
 0x298   :  { %4134 = vrot.lane.b32.xlu1 %v4470_v56, %s4321_s17  ;;  %3935 = vmatpush3.bf16.xpose.msk.msra.mxu0 %vm4466_vm2, %v3930_v54 }
 0x29f   :  { %3654 = vmatmul.mubr.msk.f32.vlgmr.msra.gmra.mrb[2].mxu0 %vm231_vm1, %v210_v39 }
 0x2a0   :  { %3660 = vmatprep.mubr.msk.f32.mxu0 %vm231_vm1, %v216_v44 }
 0x2ff   :  { %v4125_v57 = vpop.permute.xlu1 %4124 }
 0x300   :  { %v4127_v58 = vunpack.i.h.bf16 %v4125_v57  ;;  %v4126_v59 = vunpack.i.l.bf16 %v4125_v57 }
 0x302   :  { %v3936_v60 = vpack.c.bf16 %v4127_v58, %v4126_v59 }
 0x304   :  { %3938 = vmatprep.subr.msk.bf16.mxu0 %vm4466_vm2, %v3936_v60 }
 0x305   :  { %3941 = vmatpush3.bf16.xpose.msk.msra.mxu0 %vm4466_vm2, %v3936_v60 }
 0x306   :  { %v4130_v61 = vpop.permute.xlu0 %4129 }
 0x307   :  { %v4132_v62 = vunpack.i.h.bf16 %v4130_v61  ;;  %v4131_v63 = vunpack.i.l.bf16 %v4130_v61 }
 0x309   :  { %v3942_v0 = vpack.c.bf16 %v4132_v62, %v4131_v63 }
 0x30a   :  { %v4135_v1 = vpop.permute.xlu1 %4134 }
 0x30b   :  { %v4137_v2 = vunpack.i.h.bf16 %v4135_v1  ;;  %v4136_v3 = vunpack.i.l.bf16 %v4135_v1  ;;  %3944 = vmatprep.subr.msk.bf16.mxu1 %vm4466_vm2, %v3942_v0 }
 0x30c   :  { %3661 = vmatmul.mubr.msk.f32.vlgmr.msra.gmra.mrb[4].mxu0 %vm231_vm1, %v218_v43  ;;  %3947 = vmatpush3.bf16.xpose.msk.msra.mxu1 %vm4466_vm2, %v3942_v0 }
 0x30d   :  { %v3948_v4 = vpack.c.bf16 %v4137_v2, %v4136_v3  ;;  %3674 = vmatprep.mubr.msk.f32.mxu0 %vm231_vm1, %v224_v47 }
 0x30f   :  { %3950 = vmatprep.subr.msk.bf16.mxu0 %vm4466_vm2, %v3948_v4 }
 0x310   :  { %3953 = vmatpush3.bf16.xpose.msk.msra.mxu0 %vm4466_vm2, %v3948_v4 }
 0x313   :  { %3668 = vmatmul.mubr.msk.f32.vlgmr.msra.gmra.mrb[0].mxu1 %vm231_vm1, %v222_v46 }
 0x317   :  { %3675 = vmatmul.mubr.msk.f32.vlgmr.msra.gmra.mrb[6].mxu0 %vm231_vm1, %v226_v55 }
 0x372   :  { %v3655_v7 = vpop.f32.mrb[2].mxu0 }
 0x373   :  { %v312_v8 = vadd.f32 %v3655_v7, %v4499_v5  ;;  %v306_v9 = vpop.f32.mrb[3].mxu0 }
 0x374   :  { %v307_v10 = vadd.f32 %v306_v9, %v4504_v6 }
 0x375   :  { %v580_v11 = vsel %vm576_vm3, %v312_v8, -inf }
 0x376   :  { %581 = vmax.xlane.f32.xlu1 %v580_v11  ;;  %v577_v12 = vsel %vm576_vm3, %v307_v10, -inf }
 0x377   :  { %578 = vmax.xlane.f32.xlu0 %v577_v12 }
 0x3df   :  { %v3662_v13 = vpop.f32.mrb[4].mxu0 }
 0x3e0   :  { %v399_v14 = vadd.f32 %v3662_v13, %v4499_v5  ;;  %v393_v15 = vpop.f32.mrb[5].mxu0 }
 0x3e1   :  { %v394_v16 = vadd.f32 %v393_v15, %v4504_v6 }
 0x3e2   :  { %v586_v17 = vsel %vm576_vm3, %v399_v14, -inf }
 0x3e3   :  { %587 = vmax.xlane.f32.xlu0 %v586_v17  ;;  %v583_v19 = vsel %vm576_vm3, %v394_v16, -inf }
 0x3e6   :  { %v3669_v18 = vpop.f32.mrb[0].mxu1 }
 0x3e7   :  { %v486_v20 = vadd.f32 %v3669_v18, %v4499_v5  ;;  %v480_v21 = vpop.f32.mrb[1].mxu1  ;;  %584 = vmax.xlane.f32.xlu0 %v583_v19 }
 0x3e8   :  { %v481_v22 = vadd.f32 %v480_v21, %v4504_v6 }
 0x3e9   :  { %v592_v23 = vsel %vm576_vm3, %v486_v20, -inf }
 0x3ea   :  { %593 = vmax.xlane.f32.xlu1 %v592_v23  ;;  %v3676_v24 = vpop.f32.mrb[6].mxu0  ;;  %v589_v25 = vsel %vm576_vm3, %v481_v22, -inf }
 0x3eb   :  { %v573_v26 = vadd.f32 %v3676_v24, %v4499_v5  ;;  %v567_v27 = vpop.f32.mrb[7].mxu0  ;;  %590 = vmax.xlane.f32.xlu0 %v589_v25 }
 0x3ec   :  { %v568_v28 = vadd.f32 %v567_v27, %v4504_v6 }
 0x3ed   :  { %v598_v29 = vsel %vm576_vm3, %v573_v26, -inf }
 0x3ee   :  { %599 = vmax.xlane.f32.xlu1 %v598_v29  ;;  %v595_v30 = vsel %vm576_vm3, %v568_v28, -inf }
 0x3ef   :  { %596 = vmax.xlane.f32.xlu0 %v595_v30 }
 0x403   :  { %v582_v31 = vpop.xlane.xlu1 %581 }
 0x404   :  { %v602_v32 = vsub.f32 %v312_v8, %v582_v31  ;;  %v579_v33 = vpop.xlane.xlu0 %578 }
 0x405   :  { %v601_v35 = vsub.f32 %v307_v10, %v579_v33 }
 0x406   :  { %v611_v37 = vmul.f32 1.442695, %v602_v32 }
 0x407   :  { %v609_v38 = vmul.f32 1.442695, %v601_v35 }
 0x408   :  { %4202 = vpow2.f32 %v611_v37 }
 0x409   :  { %4204 = vpow2.f32 %v609_v38 }
 0x412   :  { %v4522_v39 = vpop.eup %4202 }
 0x413   :  { %v4205_v40 = vpop.eup %4204  ;;  %v628_v41 = vsel %vm576_vm3, %v4522_v39, 0.0 }
 0x414   :  { %629 = vadd.xlane.f32.xlu1 %v628_v41  ;;  %v625_v43 = vsel %vm576_vm3, %v4205_v40, 0.0 }
 0x415   :  { %626 = vadd.xlane.f32.xlu0 %v625_v43 }
 0x470   :  { %v588_v44 = vpop.xlane.xlu0 %587 }
 0x471   :  { %v604_v46 = vsub.f32 %v399_v14, %v588_v44 }
 0x473   :  { %v615_v47 = vmul.f32 1.442695, %v604_v46 }
 0x474   :  { %v585_v48 = vpop.xlane.xlu0 %584 }
 0x475   :  { %4206 = vpow2.f32 %v615_v47  ;;  %v603_v50 = vsub.f32 %v394_v16, %v585_v48 }
 0x477   :  { %v613_v51 = vmul.f32 1.442695, %v603_v50  ;;  %v594_v52 = vpop.xlane.xlu1 %593 }
 0x478   :  { %v606_v54 = vsub.f32 %v486_v20, %v594_v52  ;;  %v591_v55 = vpop.xlane.xlu0 %590 }
 0x479   :  { %4208 = vpow2.f32 %v613_v51  ;;  %v605_v57 = vsub.f32 %v481_v22, %v591_v55 }
 0x47a   :  { %v619_v58 = vmul.f32 1.442695, %v606_v54 }
 0x47b   :  { %v617_v59 = vmul.f32 1.442695, %v605_v57  ;;  %v600_v60 = vpop.xlane.xlu1 %599 }
 0x47c   :  { %4210 = vpow2.f32 %v619_v58  ;;  %v608_v61 = vsub.f32 %v573_v26, %v600_v60  ;;  %v597_v62 = vpop.xlane.xlu0 %596  ;;  %v101_v60 = vld [vmem:[%s5015_s6 + $0x8] sm:$0xff] }
 0x47d   :  { %4212 = vpow2.f32 %v617_v59  ;;  %v607_v63 = vsub.f32 %v568_v28, %v597_v62  ;;  %v100_v59 = vld [vmem:[%s5015_s6] sm:$0xff]  ;;  %v103_v62 = vld [vmem:[%s5015_s6 + $0x18] sm:$0xff] }
 0x47e   :  { %v623_v0 = vmul.f32 1.442695, %v608_v61  ;;  %v102_v61 = vld [vmem:[%s5015_s6 + $0x10] sm:$0xff] }
 0x47f   :  { %v4527_v1 = vpop.eup %4206  ;;  %v621_v2 = vmul.f32 1.442695, %v607_v63 }
 0x480   :  { %4214 = vpow2.f32 %v623_v0  ;;  %v634_v3 = vsel %vm576_vm3, %v4527_v1, 0.0 }
 0x481   :  { %4216 = vpow2.f32 %v621_v2  ;;  %635 = vadd.xlane.f32.xlu1 %v634_v3 }
 0x483   :  { %v4531_v4 = vpop.eup %4208 }
 0x484   :  { %v631_v7 = vsel %vm576_vm3, %v4531_v4, 0.0 }
 0x485   :  { %632 = vadd.xlane.f32.xlu0 %v631_v7 }
 0x486   :  { %v4535_v8 = vpop.eup %4210 }
 0x487   :  { %v4213_v9 = vpop.eup %4212  ;;  %v640_v10 = vsel %vm576_vm3, %v4535_v8, 0.0 }
 0x488   :  { %641 = vadd.xlane.f32.xlu1 %v640_v10  ;;  %v637_v11 = vsel %vm576_vm3, %v4213_v9, 0.0 }
 0x489   :  { %638 = vadd.xlane.f32.xlu0 %v637_v11 }
 0x48a   :  { %v4540_v12 = vpop.eup %4214 }
 0x48b   :  { %v4542_v13 = vpop.eup %4216  ;;  %v646_v14 = vsel %vm576_vm3, %v4540_v12, 0.0 }
 0x48c   :  { %647 = vadd.xlane.f32.xlu1 %v646_v14  ;;  %v643_v15 = vsel %vm576_vm3, %v4542_v13, 0.0 }
 0x48d   :  { %644 = vadd.xlane.f32.xlu0 %v643_v15 }
 0x49d   :  { %4144 = vrot.lane.b32.xlu1 %v4455_v45, %s4322_s1 }
 0x4a1   :  { %4149 = vrot.lane.b32.xlu1 %v4459_v49, %s4322_s1  ;;  %v630_v19 = vpop.xlane.xlu1 %629 }
 0x4a2   :  { %v627_v16 = vpop.xlane.xlu0 %626 }
 0x4a3   :  { %4218 = vrcp.f32 %v627_v16  ;;  %4139 = vrot.lane.b32.xlu0 %v4449_v42, %s4322_s1 }
 0x4a5   :  { %4154 = vrot.lane.b32.xlu1 %v4470_v56, %s4322_s1 }
 0x4ad   :  { %v4219_v17 = vpop.eup %4218 }
 0x4ae   :  { %v657_v18 = vmul.f32 %v4219_v17, %v4205_v40 }
 0x4b0   :  { %3681 = vmatprep.mubr.msk.f32.mxu1 %vm576_vm3, %v657_v18 }
 0x50e   :  { %v636_v20 = vpop.xlane.xlu1 %635 }
 0x512   :  { %v633_v21 = vpop.xlane.xlu0 %632 }
 0x515   :  { %v642_v22 = vpop.xlane.xlu1 %641 }
 0x516   :  { %v639_v45 = vpop.xlane.xlu0 %638 }
 0x517   :  { %4220 = vrcp.f32 %v639_v45 }
 0x518   :  { %4222 = vrcp.f32 %v630_v19 }
 0x519   :  { %4224 = vrcp.f32 %v633_v21  ;;  %v648_v49 = vpop.xlane.xlu1 %647 }
 0x51a   :  { %v645_v23 = vpop.xlane.xlu0 %644  ;;  %4226 = vrcp.f32 %v642_v22 }
 0x51b   :  { %4228 = vrcp.f32 %v636_v20  ;;  %v4599_v20 = vld [vmem:[%s5016_s7] sm:$0x3f] }
 0x51c   :  { %4230 = vrcp.f32 %v645_v23 }
 0x51d   :  { %v4145_v42 = vpop.permute.xlu1 %4144  ;;  %4232 = vrcp.f32 %v648_v49 }
 0x51e   :  { %v4140_v24 = vpop.permute.xlu0 %4139  ;;  %v4147_v56 = vunpack.i.h.bf16 %v4145_v42  ;;  %v4146_v25 = vunpack.i.l.bf16 %v4145_v42 }
 0x51f   :  { %v4142_v26 = vunpack.i.h.bf16 %v4140_v24  ;;  %v4141_v27 = vunpack.i.l.bf16 %v4140_v24 }
 0x520   :  { %v3958_v38 = vpack.c.bf16 %v4147_v56, %v4146_v25 }
 0x521   :  { %v4221_v28 = vpop.eup %4220  ;;  %v3954_v29 = vpack.c.bf16 %v4142_v26, %v4141_v27  ;;  %v4150_v30 = vpop.permute.xlu1 %4149 }
 0x522   :  { %v4223_v31 = vpop.eup %4222  ;;  %v4152_v32 = vunpack.i.h.bf16 %v4150_v30  ;;  %v4151_v33 = vunpack.i.l.bf16 %v4150_v30  ;;  %v661_v35 = vmul.f32 %v4221_v28, %v4213_v9  ;;  %v1351_v9 = vlaneseq }
 0x523   :  { %v4225_v37 = vpop.eup %4224  ;;  %3955 = vmatprep.subr.bf16.mxu1 %v3954_v29  ;;  %v658_v43 = vmul.f32 %v4223_v31, %v4522_v39 }
 0x524   :  { %v3962_v40 = vpack.c.bf16 %v4152_v32, %v4151_v33  ;;  %3957 = vmatpush3.bf16.msra.mxu1 %v3954_v29  ;;  %3695 = vmatprep.mubr.msk.f32.mxu0 %vm576_vm3, %v661_v35  ;;  %v4227_v41 = vpop.eup %4226  ;;  %v659_v50 = vmul.f32 %v4225_v37, %v4531_v4  ;;  %v4591_v11 = vshrl.u32 %v1351_v9, 7 }
 0x525   :  { %v4155_v44 = vpop.permute.xlu1 %4154  ;;  %3959 = vmatprep.subr.bf16.mxu1 %v3958_v38  ;;  %v4229_v46 = vpop.eup %4228  ;;  %v662_v52 = vmul.f32 %v4227_v41, %v4535_v8 }
 0x526   :  { %v4157_v47 = vunpack.i.h.bf16 %v4155_v44  ;;  %v4156_v48 = vunpack.i.l.bf16 %v4155_v44  ;;  %3963 = vmatprep.subr.bf16.mxu0 %v3962_v40  ;;  %v4231_v51 = vpop.eup %4230  ;;  %v660_v39 = vmul.f32 %v4229_v46, %v4527_v1  ;;  %v1353_v15 = vsub.s32 0, %v4591_v11 }
 0x527   :  { %3682 = vmatmul.mubr.msk.f32.vlgmr.msra.gmra.mrb[2].mxu1 %vm576_vm3, %v658_v43  ;;  %3965 = vmatpush3.bf16.msra.mxu0 %v3962_v40  ;;  %v4233_v55 = vpop.eup %4232  ;;  %v663_v57 = vmul.f32 %v4231_v51, %v4542_v13 }
 0x528   :  { %v3966_v54 = vpack.c.bf16 %v4157_v47, %v4156_v48  ;;  %3961 = vmatpush3.bf16.msra.mxu1 %v3958_v38  ;;  %3688 = vmatprep.mubr.msk.f32.mxu1 %vm576_vm3, %v659_v50  ;;  %v664_v58 = vmul.f32 %v4233_v55, %v4540_v12  ;;  %v1354_v25 = vrot.slane %v4599_v20, %v1353_v15  ;;  %v107_v55 = vld [vmem:[%s5017_s8 + $0x10] sm:$0xff] }
 0x529   :  { %3705 = vmatprep.subr.mxu0 %v100_v59 }
 0x52a   :  { %3696 = vmatmul.mubr.msk.f32.vlgmr.msra.gmra.mrb[8].mxu0 %vm576_vm3, %v662_v52  ;;  %3967 = vmatprep.subr.bf16.mxu1 %v3966_v54 }
 0x52b   :  { %3689 = vmatmul.mubr.msk.f32.vlgmr.msra.gmra.mrb[4].mxu1 %vm576_vm3, %v660_v39  ;;  %3706 = vmatpush3.msra.mxu0 %v100_v59  ;;  %v110_v59 = vld [vmem:[%s5019_s10] sm:$0xff] }
 0x52c   :  { %3969 = vmatpush3.bf16.msra.mxu1 %v3966_v54  ;;  %3702 = vmatprep.mubr.msk.f32.mxu1 %vm576_vm3, %v663_v57  ;;  %v106_v54 = vld [vmem:[%s5017_s8 + $0x8] sm:$0xff]  ;;  %v108_v57 = vld [vmem:[%s5017_s8 + $0x18] sm:$0xff] }
 0x52d   :  { %3710 = vmatprep.subr.mxu1 %v101_v60  ;;  %3715 = vmatprep.subr.mxu0 %v102_v61 }
 0x52f   :  { %3703 = vmatmul.mubr.msk.f32.vlgmr.msra.gmra.mrb[6].mxu1 %vm576_vm3, %v664_v58  ;;  %v3974_v58 = vpack.c.bf16 %v108_v57, %v107_v55 }
 0x530   :  { %3711 = vmatpush3.msra.mxu1 %v101_v60  ;;  %v111_v60 = vld [vmem:[%s5019_s10 + $0x8] sm:$0xff] }
 0x531   :  { %3720 = vmatprep.subr.mxu1 %v103_v62 }
 0x5fa   :  { %v3683_v63 = vpop.f32.mrb[2].mxu1 }
 0x5fb   :  { %v743_v0 = vpop.f32.mrb[3].mxu1 }
 0x5fc   :  { %3707 = vmatprep.mubr.msk.f32.mxu0 %vm231_vm1, %v743_v0 }
 0x5fd   :  { %v3697_v1 = vpop.f32.mrb[8].mxu0  ;;  %3708 = vmatmul.mubr.msk.f32.vlgmr.msra.gmra.mrb[10].mxu0 %vm231_vm1, %v3683_v63 }
 0x5fe   :  { %v3690_v2 = vpop.f32.mrb[4].mxu1  ;;  %v917_v3 = vpop.f32.mrb[9].mxu0  ;;  %3716 = vmatpush3.msra.mxu0 %v102_v61  ;;  %v3978_v61 = vpack.c.bf16 %v111_v60, %v110_v59 }
 0x5ff   :  { %v830_v4 = vpop.f32.mrb[5].mxu1  ;;  %3717 = vmatprep.mubr.msk.f32.mxu0 %vm231_vm1, %v917_v3 }
 0x600   :  { %3712 = vmatprep.mubr.msk.f32.mxu1 %vm231_vm1, %v830_v4  ;;  %v1387_v4 = vsub.s32 1, %v4591_v11 }
 0x601   :  { %3713 = vmatmul.mubr.msk.f32.vlgmr.msra.gmra.mrb[8].mxu1 %vm231_vm1, %v3690_v2  ;;  %3718 = vmatmul.mubr.msk.f32.vlgmr.msra.gmra.mrb[12].mxu0 %vm231_vm1, %v3697_v1 }
 0x602   :  { %v3704_v7 = vpop.f32.mrb[6].mxu1  ;;  %3721 = vmatpush3.msra.mxu1 %v103_v62 }
 0x603   :  { %v1004_v8 = vpop.f32.mrb[7].mxu1  ;;  %3979 = vmatprep.subr.bf16.mxu1 %v3978_v61 }
 0x604   :  { %3722 = vmatprep.mubr.msk.f32.mxu1 %vm231_vm1, %v1004_v8  ;;  %v1388_v8 = vrot.slane %v4599_v20, %v1387_v4 }
 0x605   :  { %3723 = vmatmul.mubr.msk.f32.vlgmr.msra.gmra.mrb[10].mxu1 %vm231_vm1, %v3704_v7  ;;  %v1393_v7 = vsub.s32 2, %v4591_v11 }
 0x606   :  { %3981 = vmatpush3.bf16.msra.mxu1 %v3978_v61 }
 0x6d0   :  { %v3709_v10 = vpop.f32.mrb[10].mxu0 }
 0x6d1   :  { %v1085_v12 = vpop.f32.mrb[11].mxu0  ;;  %v1344_v16 = vsel %vm53_vm0, %v3709_v10, 0.0 }
 0x6d2   :  { %v1337_v21 = vsel %vm53_vm0, %v1085_v12, 0.0 }
 0x6d4   :  { %v3714_v13 = vpop.f32.mrb[8].mxu1  ;;  %v3719_v14 = vpop.f32.mrb[12].mxu0 }
 0x6d5   :  { %v1345_v17 = vsel %vm53_vm0, %v3714_v13, 0.0  ;;  %v1166_v18 = vpop.f32.mrb[9].mxu1  ;;  %v1247_v19 = vpop.f32.mrb[13].mxu0  ;;  %v1347_v49 = vsel %vm53_vm0, %v3719_v14, 0.0  ;;  %v1394_v13 = vrot.slane %v4599_v20, %v1393_v7 }
 0x6d6   :  { %v1346_v22 = vadd.f32 %v1345_v17, %v1344_v16  ;;  %v1338_v45 = vsel %vm53_vm0, %v1166_v18, 0.0  ;;  %v1340_v24 = vsel %vm53_vm0, %v1247_v19, 0.0 }
 0x6d7   :  { %v1339_v23 = vadd.f32 %v1338_v45, %v1337_v21  ;;  %v113_v45 = vld [vmem:[%s5019_s10 + $0x18] sm:$0xff] }
 0x6d8   :  { %v1348_v42 = vadd.f32 %v1347_v49, %v1346_v22  ;;  %v3724_v56 = vpop.f32.mrb[10].mxu1  ;;  %v112_v22 = vld [vmem:[%s5019_s10 + $0x10] sm:$0xff] }
 0x6d9   :  { %v1341_v26 = vadd.f32 %v1340_v24, %v1339_v23  ;;  %v1349_v27 = vsel %vm53_vm0, %v3724_v56, 0.0  ;;  %v1328_v28 = vpop.f32.mrb[11].mxu1  ;;  %v3982_v49 = vpack.c.bf16 %v113_v45, %v112_v22  ;;  %v114_v23 = vld [vmem:[%s5019_s10 + $0x20] sm:$0xff]  ;;  %v116_v56 = vld [vmem:[%s5019_s10 + $0x30] sm:$0xff] }
 0x6da   :  { %v1350_v29 = vadd.f32 %v1349_v27, %v1348_v42  ;;  %v1342_v30 = vsel %vm53_vm0, %v1328_v28, 0.0  ;;  %v115_v42 = vld [vmem:[%s5019_s10 + $0x28] sm:$0xff]  ;;  %v118_v27 = vld [vmem:[%s5019_s10 + $0x40] sm:$0xff] }
 0x6db   :  { %v1343_v31 = vadd.f32 %v1342_v30, %v1341_v26  ;;  %3983 = vmatprep.subr.bf16.mxu1 %v3982_v49  ;;  %v3986_v24 = vpack.c.bf16 %v115_v42, %v114_v23  ;;  %v119_v28 = vld [vmem:[%s5019_s10 + $0x48] sm:$0xff] }
 0x6dc   :  { %v1356_v32 = vadd.f32 %v1354_v25, %v1350_v29  ;;  %3985 = vmatpush3.bf16.msra.mxu1 %v3982_v49  ;;  %v120_v29 = vld [vmem:[%s5019_s10 + $0x50] sm:$0xff]  ;;  %v3994_v30 = vpack.c.bf16 %v119_v28, %v118_v27  ;;  %v3408_v28 = vld [vmem:[%s5013_s4 + $0x28] sm:$0xff] }
 0x6dd   :  { %v1355_v33 = vadd.f32 %v1354_v25, %v1343_v31  ;;  %3987 = vmatprep.subr.bf16.mxu1 %v3986_v24  ;;  %v117_v25 = vld [vmem:[%s5019_s10 + $0x38] sm:$0xff] }
 0x6de   :  { %v1358_v35 = vadd.f32 %v1356_v32, %v4437_v36  ;;  %v3990_v26 = vpack.c.bf16 %v117_v25, %v116_v56  ;;  %v121_v31 = vld [vmem:[%s5019_s10 + $0x58] sm:$0xff] }
 0x6df   :  { %v1357_v37 = vadd.f32 %v1355_v33, %v4433_v34  ;;  %v105_v34 = vld [vmem:[%s5017_s8] sm:$0xff]  ;;  %v3998_v32 = vpack.c.bf16 %v121_v31, %v120_v29  ;;  %v3410_v31 = vld [vmem:[%s5013_s4 + $0x38] sm:$0xff] }
 0x6e0   :  { %v1362_v38 = vsel %vm53_vm0, %v1358_v35, 0.0  ;;  %v3970_v39 = vpack.c.bf16 %v106_v54, %v105_v34  ;;  %3989 = vmatpush3.bf16.msra.mxu1 %v3986_v24  ;;  %v122_v33 = vld [vmem:[%s5019_s10 + $0x60] sm:$0xff] }
 0x6e1   :  { %1363 = vadd.xlane.f32.xlu1 %v1362_v38  ;;  %v1359_v40 = vsel %vm53_vm0, %v1357_v37, 0.0  ;;  %3991 = vmatprep.subr.bf16.mxu1 %v3990_v26  ;;  %v124_v38 = vld [vmem:[%s5019_s10 + $0x70] sm:$0xff] }
 0x6e2   :  { %1360 = vadd.xlane.f32.xlu0 %v1359_v40  ;;  %3971 = vmatprep.subr.bf16.mxu0 %v3970_v39  ;;  %v125_v40 = vld [vmem:[%s5019_s10 + $0x78] sm:$0xff] }
 0x6e3   :  { %3973 = vmatpush3.bf16.msra.mxu0 %v3970_v39 }
 0x6e4   :  { %3975 = vmatprep.subr.bf16.mxu0 %v3974_v58  ;;  %3993 = vmatpush3.bf16.msra.mxu1 %v3990_v26 }
 0x6e5   :  { %3995 = vmatprep.subr.bf16.mxu1 %v3994_v30 }
 0x6e7   :  { %3977 = vmatpush3.bf16.msra.mxu0 %v3974_v58 }
 0x6e8   :  { %3997 = vmatpush3.bf16.msra.mxu1 %v3994_v30  ;;  %v3409_v30 = vld [vmem:[%s5013_s4 + $0x30] sm:$0xff] }
 0x6e9   :  { %3999 = vmatprep.subr.bf16.mxu1 %v3998_v32 }
 0x6ec   :  { %4001 = vmatpush3.bf16.msra.mxu1 %v3998_v32  ;;  %v4014_v32 = vpack.c.bf16 %v3410_v31, %v3409_v30 }
 0x76e   :  { %v1364_v41 = vpop.xlane.xlu1 %1363 }
 0x76f   :  { %v1366_v43 = vmul.f32 0.03125, %v1364_v41  ;;  %v1361_v44 = vpop.xlane.xlu0 %1360  ;;  %v4006_v41 = vpack.c.bf16 %v125_v40, %v124_v38 }
 0x770   :  { %v1365_v46 = vmul.f32 0.03125, %v1361_v44 }
 0x771   :  { %v1368_v47 = vsub.f32 %v1358_v35, %v1366_v43  ;;  %v123_v35 = vld [vmem:[%s5019_s10 + $0x68] sm:$0xff]  ;;  %v3404_v43 = vld [vmem:[%s5018_s9] ss:$0 sm:$0xff] }
 0x772   :  { %v1367_v48 = vsub.f32 %v1357_v37, %v1365_v46  ;;  %v4002_v37 = vpack.c.bf16 %v123_v35, %v122_v33 }
 0x773   :  { %v1370_v52 = vmul.f32 %v1368_v47, %v1368_v47 }
 0x774   :  { %v1369_v50 = vmul.f32 %v1367_v48, %v1367_v48  ;;  %4003 = vmatprep.subr.bf16.mxu1 %v4002_v37 }
 0x775   :  { %v1374_v36 = vsel %vm53_vm0, %v1370_v52, 0.0  ;;  %4005 = vmatpush3.bf16.msra.mxu1 %v4002_v37 }
 0x776   :  { %v1371_v51 = vsel %vm53_vm0, %v1369_v50, 0.0  ;;  %4007 = vmatprep.subr.bf16.mxu1 %v4006_v41 }
 0x777   :  { %1372 = vadd.xlane.f32.xlu0 %v1371_v51 }
 0x779   :  { %4009 = vmatpush3.bf16.msra.mxu1 %v4006_v41 }
 0x77b   :  { %1375 = vadd.xlane.f32.xlu0 %v1374_v36 }
 0x804   :  { %v1373_v62 = vpop.xlane.xlu0 %1372 }
 0x805   :  { %v1377_v63 = vmul.f32 0.03125, %v1373_v62 }
 0x807   :  { %v1379_v0 = vadd.f32 1e-12, %v1377_v63 }
 0x808   :  { %v1376_v1 = vpop.xlane.xlu0 %1375 }
 0x809   :  { %4234 = vrsqrt.f32 %v1379_v0  ;;  %v1378_v2 = vmul.f32 0.03125, %v1376_v1 }
 0x80b   :  { %v1380_v3 = vadd.f32 1e-12, %v1378_v2 }
 0x80d   :  { %4236 = vrsqrt.f32 %v1380_v3  ;;  %v1504_v3 = vsub.s32 3, %v4591_v11 }
 0x813   :  { %v4235_v10 = vpop.eup %4234 }
 0x814   :  { %v1383_v12 = vmul.f32 %v4235_v10, %v1367_v48 }
 0x816   :  { %v1389_v14 = vmul.f32 %v1388_v8, %v1383_v12 }
 0x817   :  { %v4237_v16 = vpop.eup %4236 }
 0x818   :  { %v1384_v17 = vmul.f32 %v4237_v16, %v1368_v47  ;;  %v4642_v18 = vadd.f32 %v1394_v13, %v1389_v14 }
 0x81a   :  { %v1390_v19 = vmul.f32 %v1388_v8, %v1384_v17  ;;  %3733 = vmatprep.mubr.msk.f32.mxu0 %vm53_vm0, %v4642_v18  ;;  %v1505_v8 = vrot.slane %v4599_v20, %v1504_v3 }
 0x81c   :  { %v4646_v21 = vadd.f32 %v1394_v13, %v1390_v19 }
 0x81e   :  { %3734 = vmatmul.mubr.msk.f32.vlgmr.msra.gmra.mrb[14].mxu0 %vm53_vm0, %v4646_v21 }
 0x8f1   :  { %v3735_v44 = vpop.f32.mrb[14].mxu0 }
 0x8f2   :  { %v1481_v46 = vadd.f32 %v3735_v44, %v3404_v43  ;;  %v1475_v47 = vpop.f32.mrb[15].mxu0  ;;  %v1617_v44 = vsub.s32 5, %v4591_v11 }
 0x8f3   :  { %v1476_v48 = vadd.f32 %v3404_v43, %v1475_v47  ;;  %v1611_v43 = vsub.s32 4, %v4591_v11 }
 0x8f4   :  { %v1487_v50 = vmul.f32 0.044715, %v1481_v46  ;;  %v1485_v0 = vmul.f32 0.5, %v1481_v46 }
 0x8f5   :  { %v1486_v51 = vmul.f32 0.044715, %v1476_v48  ;;  %v1484_v62 = vmul.f32 0.5, %v1476_v48 }
 0x8f6   :  { %v1489_v52 = vmul.f32 %v1487_v50, %v1481_v46 }
 0x8f7   :  { %v1488_v36 = vmul.f32 %v1486_v51, %v1476_v48 }
 0x8f8   :  { %v1491_v34 = vmul.f32 %v1489_v52, %v1481_v46  ;;  %v1618_v52 = vrot.slane %v4599_v20, %v1617_v44 }
 0x8f9   :  { %v1490_v54 = vmul.f32 %v1488_v36, %v1476_v48 }
 0x8fa   :  { %v1493_v39 = vadd.f32 %v1491_v34, %v1481_v46  ;;  %v1612_v46 = vrot.slane %v4599_v20, %v1611_v43 }
 0x8fb   :  { %v1492_v55 = vadd.f32 %v1490_v54, %v1476_v48 }
 0x8fc   :  { %v1495_v57 = vmul.f32 0.7978846, %v1493_v39 }
 0x8fd   :  { %v1494_v58 = vmul.f32 0.7978846, %v1492_v55  ;;  %v3438_v55 = vld [vmem:[%s5014_s5 + $0x1] ss:$0 sm:$0xff] }
 0x8fe   :  { %4238 = vtanh.f32 %v1495_v57 }
 0x8ff   :  { %4240 = vtanh.f32 %v1494_v58 }
 0x908   :  { %v4239_v59 = vpop.eup %4238 }
 0x909   :  { %v4241_v60 = vpop.eup %4240  ;;  %v1499_v61 = vadd.f32 1.0, %v4239_v59 }
 0x90a   :  { %v1498_v63 = vadd.f32 1.0, %v4241_v60 }
 0x90b   :  { %v1501_v2 = vmul.f32 %v1499_v61, %v1485_v0 }
 0x90c   :  { %v1500_v1 = vmul.f32 %v1498_v63, %v1484_v62 }
 0x90e   :  { %3768 = vmatprep.mubr.f32.mxu1 %v1500_v1 }
 0x90f   :  { %3769 = vmatmul.mubr.f32.vlgmr.msra.gmra.mrb[12].mxu1 %v1501_v2 }
 0x9e2   :  { %v3770_v10 = vpop.f32.mrb[12].mxu1 }
 0x9e3   :  { %v1578_v12 = vadd.f32 %v3770_v10, %v1505_v8  ;;  %v1572_v13 = vpop.f32.mrb[13].mxu1 }
 0x9e4   :  { %v1573_v14 = vadd.f32 %v1572_v13, %v1505_v8 }
 0x9e5   :  { %v1582_v16 = vadd.f32 %v1578_v12, %v4646_v21 }
 0x9e6   :  { %v1581_v17 = vadd.f32 %v1573_v14, %v4642_v18  ;;  %v3407_v18 = vld [vmem:[%s5013_s4 + $0x20] sm:$0xff] }
 0x9e7   :  { %v1586_v19 = vsel %vm53_vm0, %v1582_v16, 0.0  ;;  %v4010_v29 = vpack.c.bf16 %v3408_v28, %v3407_v18 }
 0x9e8   :  { %1587 = vadd.xlane.f32.xlu1 %v1586_v19  ;;  %v1583_v22 = vsel %vm53_vm0, %v1581_v17, 0.0 }
 0x9e9   :  { %1584 = vadd.xlane.f32.xlu0 %v1583_v22  ;;  %4011 = vmatprep.subr.bf16.mxu0 %v4010_v29 }
 0x9ea   :  { %4013 = vmatpush3.bf16.msra.mxu0 %v4010_v29 }
 0x9eb   :  { %4015 = vmatprep.subr.bf16.mxu0 %v4014_v32 }
 0x9ee   :  { %4017 = vmatpush3.bf16.msra.mxu0 %v4014_v32 }
 0xa75   :  { %v1588_v45 = vpop.xlane.xlu1 %1587 }
 0xa76   :  { %v1590_v49 = vmul.f32 0.03125, %v1588_v45  ;;  %v1585_v23 = vpop.xlane.xlu0 %1584 }
 0xa77   :  { %v1589_v42 = vmul.f32 0.03125, %v1585_v23 }
 0xa78   :  { %v1592_v24 = vsub.f32 %v1582_v16, %v1590_v49 }
 0xa79   :  { %v1591_v56 = vsub.f32 %v1581_v17, %v1589_v42 }
 0xa7a   :  { %v1594_v25 = vmul.f32 %v1592_v24, %v1592_v24 }
 0xa7b   :  { %v1593_v26 = vmul.f32 %v1591_v56, %v1591_v56 }
 0xa7c   :  { %v1598_v27 = vsel %vm53_vm0, %v1594_v25, 0.0 }
 0xa7d   :  { %1599 = vadd.xlane.f32.xlu1 %v1598_v27  ;;  %v1595_v21 = vsel %vm53_vm0, %v1593_v26, 0.0 }
 0xa7e   :  { %1596 = vadd.xlane.f32.xlu0 %v1595_v21 }
 0xb0a   :  { %v1600_v33 = vpop.xlane.xlu1 %1599 }
 0xb0b   :  { %v1602_v35 = vmul.f32 0.03125, %v1600_v33  ;;  %v1597_v37 = vpop.xlane.xlu0 %1596 }
 0xb0c   :  { %v1601_v38 = vmul.f32 0.03125, %v1597_v37 }
 0xb0d   :  { %v1604_v40 = vadd.f32 1e-12, %v1602_v35 }
 0xb0e   :  { %v1603_v41 = vadd.f32 1e-12, %v1601_v38 }
 0xb0f   :  { %4242 = vrsqrt.f32 %v1604_v40 }
 0xb10   :  { %4244 = vrsqrt.f32 %v1603_v41 }
 0xb19   :  { %v4243_v47 = vpop.eup %4242 }
 0xb1a   :  { %v4245_v48 = vpop.eup %4244  ;;  %v1608_v50 = vmul.f32 %v4243_v47, %v1592_v24 }
 0xb1b   :  { %v1607_v51 = vmul.f32 %v4245_v48, %v1591_v56 }
 0xb1c   :  { %v1614_v36 = vmul.f32 %v1612_v46, %v1608_v50 }
 0xb1d   :  { %v1613_v34 = vmul.f32 %v1612_v46, %v1607_v51 }
 0xb1e   :  { %v4727_v39 = vadd.f32 %v1618_v52, %v1614_v36 }
 0xb1f   :  { %v4725_v54 = vadd.f32 %v1618_v52, %v1613_v34 }
 0xb21   :  { %3779 = vmatprep.mubr.msk.f32.mxu0 %vm53_vm0, %v4725_v54 }
 0xb22   :  { %3780 = vmatmul.mubr.msk.f32.vlgmr.msra.gmra.mrb[16].mxu0 %vm53_vm0, %v4727_v39 }
 0xbf5   :  { %v3781_v57 = vpop.f32.mrb[16].mxu0 }
 0xbf6   :  { %v1743_v58 = vadd.f32 %v3781_v57, %v3438_v55  ;;  %v1737_v59 = vpop.f32.mrb[17].mxu0 }
 0xbf7   :  { %v1738_v20 = vadd.f32 %v3438_v55, %v1737_v59 }
 0xbf8   :  { %1750 = vrot.lane.b32.xlu1 %v1743_v58, %s4318_s3 }
 0xbf9   :  { %1748 = vrot.lane.b32.xlu0 %v1738_v20, %s4318_s3  ;;  %3786 = vmatprep.mubr.msk.f32.mxu0 %vm231_vm1, %v1738_v20  ;;  %v4741_v60 = vpack.i.bf16 %v1743_v58, %v1738_v20 }
 0xbfc   :  { %1754 = vrot.lane.b32.xlu1 %v1743_v58, %s4319_s15 }
 0xbfd   :  { %1756 = vrot.lane.b32.xlu0 %v1738_v20, %s4320_s16 }
 0xc00   :  { %1752 = vrot.lane.b32.xlu1 %v1738_v20, %s4319_s15 }
 0xc01   :  { %4159 = vrot.lane.b32.xlu0 %v4741_v60, %s4321_s17 }
 0xc04   :  { %1758 = vrot.lane.b32.xlu1 %v1743_v58, %s4320_s16 }
 0xc6a   :  { %v1751_v61 = vpop.permute.xlu1 %1750 }
 0xc6b   :  { %v1749_v62 = vpop.permute.xlu0 %1748 }
 0xc6c   :  { %v4747_v63 = vpack.i.bf16 %v1751_v61, %v1749_v62 }
 0xc6e   :  { %v1755_v0 = vpop.permute.xlu1 %1754  ;;  %4164 = vrot.lane.b32.xlu1 %v4747_v63, %s4321_s17 }
 0xc6f   :  { %v1757_v1 = vpop.permute.xlu0 %1756 }
 0xc70   :  { %3807 = vmatprep.mubr.msk.f32.mxu1 %vm231_vm1, %v1757_v1 }
 0xc72   :  { %v1753_v2 = vpop.permute.xlu1 %1752 }
 0xc73   :  { %v4752_v8 = vpack.i.bf16 %v1755_v0, %v1753_v2  ;;  %v4160_v10 = vpop.permute.xlu0 %4159 }
 0xc74   :  { %v4162_v12 = vunpack.i.h.bf16 %v4160_v10  ;;  %v4161_v13 = vunpack.i.l.bf16 %v4160_v10 }
 0xc75   :  { %4169 = vrot.lane.b32.xlu0 %v4752_v8, %s4321_s17 }
 0xc76   :  { %v4018_v14 = vpack.c.bf16 %v4162_v12, %v4161_v13  ;;  %v1759_v16 = vpop.permute.xlu1 %1758 }
 0xc77   :  { %v4756_v17 = vpack.i.bf16 %v1759_v16, %v1757_v1 }
 0xc78   :  { %4020 = vmatprep.subr.msk.bf16.mxu0 %vm4466_vm2, %v4018_v14 }
 0xc79   :  { %4174 = vrot.lane.b32.xlu1 %v4756_v17, %s4321_s17  ;;  %4023 = vmatpush3.bf16.xpose.msk.msra.mxu0 %vm4466_vm2, %v4018_v14 }
 0xc80   :  { %3787 = vmatmul.mubr.msk.f32.vlgmr.msra.gmra.mrb[18].mxu0 %vm231_vm1, %v1743_v58 }
 0xc81   :  { %3793 = vmatprep.mubr.msk.f32.mxu0 %vm231_vm1, %v1749_v62 }
 0xce0   :  { %v4165_v19 = vpop.permute.xlu1 %4164 }
 0xce1   :  { %v4167_v22 = vunpack.i.h.bf16 %v4165_v19  ;;  %v4166_v45 = vunpack.i.l.bf16 %v4165_v19 }
 0xce3   :  { %v4024_v49 = vpack.c.bf16 %v4167_v22, %v4166_v45 }
 0xce5   :  { %4026 = vmatprep.subr.msk.bf16.mxu0 %vm4466_vm2, %v4024_v49 }
 0xce6   :  { %4029 = vmatpush3.bf16.xpose.msk.msra.mxu0 %vm4466_vm2, %v4024_v49 }
 0xce7   :  { %v4170_v23 = vpop.permute.xlu0 %4169 }
 0xce8   :  { %v4172_v42 = vunpack.i.h.bf16 %v4170_v23  ;;  %v4171_v24 = vunpack.i.l.bf16 %v4170_v23 }
 0xcea   :  { %v4030_v56 = vpack.c.bf16 %v4172_v42, %v4171_v24 }
 0xceb   :  { %v4175_v25 = vpop.permute.xlu1 %4174 }
 0xcec   :  { %v4177_v26 = vunpack.i.h.bf16 %v4175_v25  ;;  %v4176_v27 = vunpack.i.l.bf16 %v4175_v25  ;;  %4032 = vmatprep.subr.msk.bf16.mxu0 %vm4466_vm2, %v4030_v56 }
 0xced   :  { %3794 = vmatmul.mubr.msk.f32.vlgmr.msra.gmra.mrb[20].mxu0 %vm231_vm1, %v1751_v61 }
 0xcee   :  { %v4036_v21 = vpack.c.bf16 %v4177_v26, %v4176_v27  ;;  %4035 = vmatpush3.bf16.xpose.msk.msra.mxu0 %vm4466_vm2, %v4030_v56  ;;  %3800 = vmatprep.mubr.msk.f32.mxu0 %vm231_vm1, %v1753_v2 }
 0xcf0   :  { %4038 = vmatprep.subr.msk.bf16.mxu1 %vm4466_vm2, %v4036_v21 }
 0xcf1   :  { %4041 = vmatpush3.bf16.xpose.msk.msra.mxu1 %vm4466_vm2, %v4036_v21 }
 0xcf5   :  { %3801 = vmatmul.mubr.msk.f32.vlgmr.msra.gmra.mrb[22].mxu0 %vm231_vm1, %v1755_v0 }
 0xcf8   :  { %3808 = vmatmul.mubr.msk.f32.vlgmr.msra.gmra.mrb[14].mxu1 %vm231_vm1, %v1759_v16 }
 0xd53   :  { %v3788_v18 = vpop.f32.mrb[18].mxu0 }
 0xd54   :  { %v1844_v28 = vadd.f32 %v3788_v18, %v4499_v5  ;;  %v1838_v29 = vpop.f32.mrb[19].mxu0 }
 0xd55   :  { %v1839_v30 = vadd.f32 %v1838_v29, %v4504_v6 }
 0xd56   :  { %v2111_v31 = vsel %vm576_vm3, %v1844_v28, -inf }
 0xd57   :  { %2112 = vmax.xlane.f32.xlu1 %v2111_v31  ;;  %v2108_v32 = vsel %vm576_vm3, %v1839_v30, -inf }
 0xd58   :  { %2109 = vmax.xlane.f32.xlu0 %v2108_v32 }
 0xdc0   :  { %v3795_v33 = vpop.f32.mrb[20].mxu0 }
 0xdc1   :  { %v1931_v53 = vadd.f32 %v3795_v33, %v4499_v5  ;;  %v1925_v35 = vpop.f32.mrb[21].mxu0 }
 0xdc2   :  { %v1926_v37 = vadd.f32 %v1925_v35, %v4504_v6 }
 0xdc3   :  { %v2117_v38 = vsel %vm576_vm3, %v1931_v53, -inf }
 0xdc4   :  { %2118 = vmax.xlane.f32.xlu0 %v2117_v38  ;;  %v2114_v40 = vsel %vm576_vm3, %v1926_v37, -inf }
 0xdc8   :  { %v3802_v41 = vpop.f32.mrb[22].mxu0  ;;  %2115 = vmax.xlane.f32.xlu0 %v2114_v40 }
 0xdc9   :  { %v2018_v46 = vadd.f32 %v3802_v41, %v4499_v5  ;;  %v2012_v47 = vpop.f32.mrb[23].mxu0 }
 0xdca   :  { %v2013_v48 = vadd.f32 %v2012_v47, %v4504_v6 }
 0xdcb   :  { %v3809_v50 = vpop.f32.mrb[14].mxu1  ;;  %v2123_v51 = vsel %vm576_vm3, %v2018_v46, -inf }
 0xdcc   :  { %v2105_v52 = vadd.f32 %v3809_v50, %v4499_v5  ;;  %v2099_v36 = vpop.f32.mrb[15].mxu1  ;;  %2124 = vmax.xlane.f32.xlu1 %v2123_v51  ;;  %v2120_v34 = vsel %vm576_vm3, %v2013_v48, -inf }
 0xdcd   :  { %v2100_v55 = vadd.f32 %v2099_v36, %v4504_v6  ;;  %2121 = vmax.xlane.f32.xlu0 %v2120_v34 }
 0xdce   :  { %v2129_v57 = vsel %vm576_vm3, %v2105_v52, -inf }
 0xdcf   :  { %v2126_v58 = vsel %vm576_vm3, %v2100_v55, -inf }
 0xdd0   :  { %2130 = vmax.xlane.f32.xlu1 %v2129_v57 }
 0xdd1   :  { %2127 = vmax.xlane.f32.xlu0 %v2126_v58 }
 0xde4   :  { %v2113_v59 = vpop.xlane.xlu1 %2112 }
 0xde5   :  { %v2133_v20 = vsub.f32 %v1844_v28, %v2113_v59  ;;  %v2110_v61 = vpop.xlane.xlu0 %2109 }
 0xde6   :  { %v2132_v62 = vsub.f32 %v1839_v30, %v2110_v61 }
 0xde7   :  { %v2142_v0 = vmul.f32 1.442695, %v2133_v20 }
 0xde8   :  { %v2140_v1 = vmul.f32 1.442695, %v2132_v62 }
 0xde9   :  { %4246 = vpow2.f32 %v2142_v0 }
 0xdea   :  { %4248 = vpow2.f32 %v2140_v1 }
 0xdf3   :  { %v4798_v5 = vpop.eup %4246 }
 0xdf4   :  { %v4249_v2 = vpop.eup %4248  ;;  %v2159_v6 = vsel %vm576_vm3, %v4798_v5, 0.0 }
 0xdf5   :  { %2160 = vadd.xlane.f32.xlu1 %v2159_v6  ;;  %v2156_v10 = vsel %vm576_vm3, %v4249_v2, 0.0 }
 0xdf6   :  { %2157 = vadd.xlane.f32.xlu0 %v2156_v10 }
 0xe51   :  { %v2119_v12 = vpop.xlane.xlu0 %2118 }
 0xe52   :  { %v2135_v13 = vsub.f32 %v1931_v53, %v2119_v12 }
 0xe54   :  { %v2146_v14 = vmul.f32 1.442695, %v2135_v13 }
 0xe55   :  { %v2116_v16 = vpop.xlane.xlu0 %2115 }
 0xe56   :  { %4250 = vpow2.f32 %v2146_v14  ;;  %v2134_v19 = vsub.f32 %v1926_v37, %v2116_v16 }
 0xe58   :  { %v2144_v22 = vmul.f32 1.442695, %v2134_v19 }
 0xe59   :  { %v2125_v45 = vpop.xlane.xlu1 %2124 }
 0xe5a   :  { %4252 = vpow2.f32 %v2144_v22  ;;  %v2122_v49 = vpop.xlane.xlu0 %2121  ;;  %v2137_v23 = vsub.f32 %v2018_v46, %v2125_v45 }
 0xe5b   :  { %v2136_v42 = vsub.f32 %v2013_v48, %v2122_v49 }
 0xe5c   :  { %v2150_v21 = vmul.f32 1.442695, %v2137_v23 }
 0xe5d   :  { %v2131_v24 = vpop.xlane.xlu1 %2130  ;;  %v2148_v28 = vmul.f32 1.442695, %v2136_v42 }
 0xe5e   :  { %v2139_v56 = vsub.f32 %v2105_v52, %v2131_v24  ;;  %v2128_v25 = vpop.xlane.xlu0 %2127 }
 0xe5f   :  { %v2138_v26 = vsub.f32 %v2100_v55, %v2128_v25 }
 0xe60   :  { %v4803_v27 = vpop.eup %4250  ;;  %v2154_v18 = vmul.f32 1.442695, %v2139_v56 }
 0xe61   :  { %v2152_v29 = vmul.f32 1.442695, %v2138_v26  ;;  %v2165_v30 = vsel %vm576_vm3, %v4803_v27, 0.0 }
 0xe62   :  { %4254 = vpow2.f32 %v2154_v18  ;;  %2166 = vadd.xlane.f32.xlu1 %v2165_v30  ;;  %v3413_v18 = vld [vmem:[%s5015_s6 + $0x28] sm:$0xff]  ;;  %v3415_v30 = vld [vmem:[%s5015_s6 + $0x38] sm:$0xff] }
 0xe63   :  { %4256 = vpow2.f32 %v2152_v29  ;;  %v3414_v29 = vld [vmem:[%s5015_s6 + $0x30] sm:$0xff] }
 0xe64   :  { %v4253_v31 = vpop.eup %4252  ;;  %4258 = vpow2.f32 %v2150_v21 }
 0xe65   :  { %4260 = vpow2.f32 %v2148_v28  ;;  %v2162_v32 = vsel %vm576_vm3, %v4253_v31, 0.0  ;;  %v3412_v28 = vld [vmem:[%s5015_s6 + $0x20] sm:$0xff] }
 0xe66   :  { %2163 = vadd.xlane.f32.xlu0 %v2162_v32 }
 0xe6c   :  { %v4808_v33 = vpop.eup %4254 }
 0xe6d   :  { %v4257_v53 = vpop.eup %4256  ;;  %v2177_v35 = vsel %vm576_vm3, %v4808_v33, 0.0 }
 0xe6e   :  { %v4812_v37 = vpop.eup %4258  ;;  %2178 = vadd.xlane.f32.xlu1 %v2177_v35  ;;  %v2174_v38 = vsel %vm576_vm3, %v4257_v53, 0.0 }
 0xe6f   :  { %v4261_v40 = vpop.eup %4260  ;;  %2175 = vadd.xlane.f32.xlu0 %v2174_v38  ;;  %v2171_v41 = vsel %vm576_vm3, %v4812_v37, 0.0 }
 0xe70   :  { %v2168_v46 = vsel %vm576_vm3, %v4261_v40, 0.0 }
 0xe72   :  { %2172 = vadd.xlane.f32.xlu1 %v2171_v41 }
 0xe73   :  { %2169 = vadd.xlane.f32.xlu0 %v2168_v46 }
 0xe82   :  { %v2161_v51 = vpop.xlane.xlu1 %2160 }
 0xe83   :  { %4184 = vrot.lane.b32.xlu1 %v4747_v63, %s4322_s1  ;;  %v2158_v47 = vpop.xlane.xlu0 %2157 }
 0xe84   :  { %4262 = vrcp.f32 %v2158_v47 }
 0xe87   :  { %4189 = vrot.lane.b32.xlu1 %v4752_v8, %s4322_s1 }
 0xe89   :  { %4179 = vrot.lane.b32.xlu0 %v4741_v60, %s4322_s1 }
 0xe8b   :  { %4194 = vrot.lane.b32.xlu1 %v4756_v17, %s4322_s1 }
 0xe8e   :  { %v4263_v48 = vpop.eup %4262 }
 0xe8f   :  { %v2188_v50 = vmul.f32 %v4263_v48, %v4249_v2 }
 0xe91   :  { %3814 = vmatprep.mubr.msk.f32.mxu0 %vm576_vm3, %v2188_v50 }
 0xeef   :  { %v2167_v36 = vpop.xlane.xlu1 %2166 }
 0xef3   :  { %v2164_v52 = vpop.xlane.xlu0 %2163 }
 0xef4   :  { %4264 = vrcp.f32 %v2164_v52 }
 0xef5   :  { %4266 = vrcp.f32 %v2161_v51 }
 0xef6   :  { %4268 = vrcp.f32 %v2167_v36 }
 0xefb   :  { %v2179_v63 = vpop.xlane.xlu1 %2178 }
 0xefc   :  { %v2176_v34 = vpop.xlane.xlu0 %2175 }
 0xefd   :  { %4270 = vrcp.f32 %v2176_v34 }
 0xefe   :  { %v4265_v55 = vpop.eup %4264 }
 0xeff   :  { %v2173_v8 = vpop.xlane.xlu1 %2172  ;;  %v2190_v57 = vmul.f32 %v4265_v55, %v4253_v31  ;;  %v4267_v0 = vpop.eup %4266 }
 0xf00   :  { %v2170_v60 = vpop.xlane.xlu0 %2169  ;;  %v4269_v2 = vpop.eup %4268  ;;  %v2189_v45 = vmul.f32 %v4267_v0, %v4798_v5 }
 0xf01   :  { %4272 = vrcp.f32 %v2170_v60  ;;  %3821 = vmatprep.mubr.msk.f32.mxu1 %vm576_vm3, %v2190_v57  ;;  %v2191_v16 = vmul.f32 %v4269_v2, %v4803_v27 }
 0xf02   :  { %4274 = vrcp.f32 %v2173_v8  ;;  %v4865_v8 = vld [vmem:[%s5016_s7 + $0x8] sm:$0x3f] }
 0xf03   :  { %v4185_v17 = vpop.permute.xlu1 %4184  ;;  %4276 = vrcp.f32 %v2179_v63 }
 0xf04   :  { %v4187_v58 = vunpack.i.h.bf16 %v4185_v17  ;;  %v4186_v59 = vunpack.i.l.bf16 %v4185_v17  ;;  %v4180_v20 = vpop.permute.xlu0 %4179 }
 0xf05   :  { %v4182_v61 = vunpack.i.h.bf16 %v4180_v20  ;;  %v4181_v62 = vunpack.i.l.bf16 %v4180_v20 }
 0xf06   :  { %v4046_v1 = vpack.c.bf16 %v4187_v58, %v4186_v59 }
 0xf07   :  { %v4042_v6 = vpack.c.bf16 %v4182_v61, %v4181_v62  ;;  %v4190_v10 = vpop.permute.xlu1 %4189  ;;  %v4271_v12 = vpop.eup %4270  ;;  %v2885_v61 = vrot.slane %v4865_v8, %v1353_v15 }
 0xf08   :  { %v4192_v13 = vunpack.i.h.bf16 %v4190_v10  ;;  %v4191_v14 = vunpack.i.l.bf16 %v4190_v10  ;;  %4047 = vmatprep.subr.bf16.mxu1 %v4046_v1  ;;  %v2194_v23 = vmul.f32 %v4271_v12, %v4257_v53 }
 0xf09   :  { %4043 = vmatprep.subr.bf16.mxu0 %v4042_v6  ;;  %4049 = vmatpush3.bf16.msra.mxu1 %v4046_v1 }
 0xf0a   :  { %v4050_v19 = vpack.c.bf16 %v4192_v13, %v4191_v14  ;;  %4045 = vmatpush3.bf16.msra.mxu0 %v4042_v6 }
 0xf0b   :  { %v4273_v22 = vpop.eup %4272  ;;  %v4195_v49 = vpop.permute.xlu1 %4194 }
 0xf0c   :  { %v4275_v42 = vpop.eup %4274  ;;  %v4197_v24 = vunpack.i.h.bf16 %v4195_v49  ;;  %v4196_v56 = vunpack.i.l.bf16 %v4195_v49  ;;  %3822 = vmatmul.mubr.msk.f32.vlgmr.msra.gmra.mrb[16].mxu1 %vm576_vm3, %v2191_v16  ;;  %4051 = vmatprep.subr.bf16.mxu0 %v4050_v19  ;;  %v2192_v25 = vmul.f32 %v4273_v22, %v4261_v40 }
 0xf0d   :  { %3815 = vmatmul.mubr.msk.f32.vlgmr.msra.gmra.mrb[24].mxu0 %vm576_vm3, %v2189_v45  ;;  %3835 = vmatprep.mubr.msk.f32.mxu1 %vm576_vm3, %v2194_v23  ;;  %v4277_v27 = vpop.eup %4276  ;;  %v2193_v5 = vmul.f32 %v4275_v42, %v4812_v37 }
 0xf0e   :  { %v4054_v26 = vpack.c.bf16 %v4197_v24, %v4196_v56  ;;  %4053 = vmatpush3.bf16.msra.mxu0 %v4050_v19  ;;  %3828 = vmatprep.mubr.msk.f32.mxu0 %vm576_vm3, %v2192_v25  ;;  %v2195_v21 = vmul.f32 %v4277_v27, %v4808_v33 }
 0xf0f   :  { %3838 = vmatprep.subr.mxu0 %v3412_v28 }
 0xf10   :  { %4055 = vmatprep.subr.bf16.mxu1 %v4054_v26 }
 0xf11   :  { %3829 = vmatmul.mubr.msk.f32.vlgmr.msra.gmra.mrb[26].mxu0 %vm576_vm3, %v2193_v5  ;;  %4057 = vmatpush3.bf16.msra.mxu1 %v4054_v26  ;;  %v3418_v26 = vld [vmem:[%s5017_s8 + $0x28] sm:$0xff]  ;;  %v3419_v5 = vld [vmem:[%s5017_s8 + $0x30] sm:$0xff] }
 0xf12   :  { %3843 = vmatprep.subr.mxu1 %v3413_v18  ;;  %3839 = vmatpush3.msra.mxu0 %v3412_v28  ;;  %v3422_v28 = vld [vmem:[%s5019_s10 + $0x80] sm:$0xff] }
 0xf13   :  { %3848 = vmatprep.subr.mxu0 %v3414_v29 }
 0xf14   :  { %3836 = vmatmul.mubr.msk.f32.vlgmr.msra.gmra.mrb[18].mxu1 %vm576_vm3, %v2195_v21  ;;  %v3420_v21 = vld [vmem:[%s5017_s8 + $0x38] sm:$0xff] }
 0xf15   :  { %3844 = vmatpush3.msra.mxu1 %v3413_v18  ;;  %v4062_v18 = vpack.c.bf16 %v3420_v21, %v3419_v5 }
 0xf16   :  { %3853 = vmatprep.subr.mxu1 %v3415_v30 }
 0xfdf   :  { %v3823_v31 = vpop.f32.mrb[16].mxu1 }
 0xfe0   :  { %v3816_v32 = vpop.f32.mrb[24].mxu0  ;;  %v2361_v33 = vpop.f32.mrb[17].mxu1 }
 0xfe1   :  { %v2274_v53 = vpop.f32.mrb[25].mxu0  ;;  %3845 = vmatprep.mubr.msk.f32.mxu1 %vm231_vm1, %v2361_v33 }
 0xfe2   :  { %3840 = vmatprep.mubr.msk.f32.mxu0 %vm231_vm1, %v2274_v53  ;;  %3846 = vmatmul.mubr.msk.f32.vlgmr.msra.gmra.mrb[20].mxu1 %vm231_vm1, %v3823_v31 }
 0xfe3   :  { %3841 = vmatmul.mubr.msk.f32.vlgmr.msra.gmra.mrb[28].mxu0 %vm231_vm1, %v3816_v32  ;;  %3854 = vmatpush3.msra.mxu1 %v3415_v30 }
 0xfe4   :  { %v3830_v35 = vpop.f32.mrb[26].mxu0  ;;  %3849 = vmatpush3.msra.mxu0 %v3414_v29  ;;  %v3423_v29 = vld [vmem:[%s5019_s10 + $0x88] sm:$0xff] }
 0xfe5   :  { %v2448_v37 = vpop.f32.mrb[27].mxu0  ;;  %v4066_v30 = vpack.c.bf16 %v3423_v29, %v3422_v28 }
 0xfe6   :  { %3850 = vmatprep.mubr.msk.f32.mxu0 %vm231_vm1, %v2448_v37 }
 0xfe7   :  { %v3837_v38 = vpop.f32.mrb[18].mxu1  ;;  %3851 = vmatmul.mubr.msk.f32.vlgmr.msra.gmra.mrb[30].mxu0 %vm231_vm1, %v3830_v35  ;;  %4067 = vmatprep.subr.bf16.mxu1 %v4066_v30 }
 0xfe8   :  { %v2535_v40 = vpop.f32.mrb[19].mxu1 }
 0xfe9   :  { %3855 = vmatprep.mubr.msk.f32.mxu1 %vm231_vm1, %v2535_v40 }
 0xfea   :  { %3856 = vmatmul.mubr.msk.f32.vlgmr.msra.gmra.mrb[22].mxu1 %vm231_vm1, %v3837_v38  ;;  %v2919_v38 = vrot.slane %v4865_v8, %v1387_v4  ;;  %v3424_v4 = vld [vmem:[%s5019_s10 + $0x90] sm:$0xff] }
 0xfeb   :  { %4069 = vmatpush3.bf16.msra.mxu1 %v4066_v30 }
0x10b5   :  { %v3847_v41 = vpop.f32.mrb[20].mxu1 }
0x10b6   :  { %v2876_v46 = vsel %vm53_vm0, %v3847_v41, 0.0  ;;  %v3842_v47 = vpop.f32.mrb[28].mxu0  ;;  %v2697_v48 = vpop.f32.mrb[21].mxu1 }
0x10b7   :  { %v2875_v50 = vsel %vm53_vm0, %v3842_v47, 0.0  ;;  %v2869_v51 = vsel %vm53_vm0, %v2697_v48, 0.0  ;;  %v2616_v52 = vpop.f32.mrb[29].mxu0 }
0x10b8   :  { %v2877_v36 = vadd.f32 %v2876_v46, %v2875_v50  ;;  %v2868_v63 = vsel %vm53_vm0, %v2616_v52, 0.0  ;;  %v2925_v46 = vrot.slane %v4865_v8, %v1393_v7  ;;  %v3425_v7 = vld [vmem:[%s5019_s10 + $0x98] sm:$0xff] }
0x10b9   :  { %v2870_v34 = vadd.f32 %v2869_v51, %v2868_v63  ;;  %v4070_v63 = vpack.c.bf16 %v3425_v7, %v3424_v4 }
0x10ba   :  { %v3852_v55 = vpop.f32.mrb[30].mxu0 }
0x10bb   :  { %v2878_v57 = vsel %vm53_vm0, %v3852_v55, 0.0  ;;  %v2778_v60 = vpop.f32.mrb[31].mxu0  ;;  %4071 = vmatprep.subr.bf16.mxu1 %v4070_v63  ;;  %v3427_v55 = vld [vmem:[%s5019_s10 + $0xa8] sm:$0xff] }
0x10bc   :  { %v2879_v17 = vadd.f32 %v2878_v57, %v2877_v36  ;;  %v2871_v58 = vsel %vm53_vm0, %v2778_v60, 0.0  ;;  %4073 = vmatpush3.bf16.msra.mxu1 %v4070_v63  ;;  %v3428_v60 = vld [vmem:[%s5019_s10 + $0xb0] sm:$0xff] }
0x10bd   :  { %v2872_v59 = vadd.f32 %v2871_v58, %v2870_v34  ;;  %v3857_v20 = vpop.f32.mrb[22].mxu1  ;;  %v3426_v34 = vld [vmem:[%s5019_s10 + $0xa0] sm:$0xff] }
0x10be   :  { %v2880_v62 = vsel %vm53_vm0, %v3857_v20, 0.0  ;;  %v2859_v0 = vpop.f32.mrb[23].mxu1  ;;  %v4074_v57 = vpack.c.bf16 %v3427_v55, %v3426_v34  ;;  %v3431_v20 = vld [vmem:[%s5019_s10 + $0xc8] sm:$0xff] }
0x10bf   :  { %v2881_v1 = vadd.f32 %v2880_v62, %v2879_v17  ;;  %v2873_v2 = vsel %vm53_vm0, %v2859_v0, 0.0  ;;  %v3429_v17 = vld [vmem:[%s5019_s10 + $0xb8] sm:$0xff] }
0x10c0   :  { %v2874_v6 = vadd.f32 %v2873_v2, %v2872_v59  ;;  %4075 = vmatprep.subr.bf16.mxu1 %v4074_v57  ;;  %v4078_v58 = vpack.c.bf16 %v3429_v17, %v3428_v60  ;;  %v3430_v59 = vld [vmem:[%s5019_s10 + $0xc0] sm:$0xff]  ;;  %v3433_v0 = vld [vmem:[%s5019_s10 + $0xd8] sm:$0xff]  ;;  %v3154_v17 = vld [vmem:[%s5020_s11 + $0x10] sm:$0xff] }
0x10c1   :  { %v2887_v10 = vadd.f32 %v2885_v61, %v2881_v1  ;;  %4077 = vmatpush3.bf16.msra.mxu1 %v4074_v57  ;;  %v4082_v62 = vpack.c.bf16 %v3431_v20, %v3430_v59  ;;  %v3434_v2 = vld [vmem:[%s5019_s10 + $0xe0] sm:$0xff]  ;;  %v3153_v57 = vld [vmem:[%s5020_s11 + $0x8] sm:$0xff] }
0x10c2   :  { %v2886_v12 = vadd.f32 %v2885_v61, %v2874_v6  ;;  %v3432_v61 = vld [vmem:[%s5019_s10 + $0xd0] sm:$0xff]  ;;  %4079 = vmatprep.subr.bf16.mxu1 %v4078_v58  ;;  %v3435_v6 = vld [vmem:[%s5019_s10 + $0xe8] sm:$0xff] }
0x10c3   :  { %v2889_v13 = vadd.f32 %v2887_v10, %v4727_v39  ;;  %v4086_v1 = vpack.c.bf16 %v3433_v0, %v3432_v61  ;;  %v4090_v10 = vpack.c.bf16 %v3435_v6, %v3434_v2  ;;  %v3143_v6 = vrot.slane %v4865_v8, %v1611_v43 }
0x10c4   :  { %v2888_v14 = vadd.f32 %v2886_v12, %v4725_v54  ;;  %v3417_v54 = vld [vmem:[%s5017_s8 + $0x20] sm:$0xff]  ;;  %v3436_v12 = vld [vmem:[%s5019_s10 + $0xf0] sm:$0xff]  ;;  %v4325_v43 = vmov 0.0  }
0x10c5   :  { %v2893_v16 = vsel %vm53_vm0, %v2889_v13, 0.0  ;;  %v4058_v27 = vpack.c.bf16 %v3418_v26, %v3417_v54  ;;  %4081 = vmatpush3.bf16.msra.mxu1 %v4078_v58  ;;  %v3155_v58 = vld [vmem:[%s5020_s11 + $0x18] sm:$0xff] }
0x10c6   :  { %2894 = vadd.xlane.f32.xlu1 %v2893_v16  ;;  %v2890_v19 = vsel %vm53_vm0, %v2888_v14, 0.0  ;;  %4083 = vmatprep.subr.bf16.mxu1 %v4082_v62  ;;  %v3473_v16 = vld [vmem:[%s5018_s9 + $0x1] ss:$0 sm:$0xff]  ;;  %v4102_v59 = vpack.c.bf16 %v3155_v58, %v3154_v17 }
0x10c7   :  { %2891 = vadd.xlane.f32.xlu0 %v2890_v19  ;;  %4059 = vmatprep.subr.bf16.mxu0 %v4058_v27 }
0x10c8   :  { %4061 = vmatpush3.bf16.msra.mxu0 %v4058_v27 }
0x10c9   :  { %4063 = vmatprep.subr.bf16.mxu0 %v4062_v18  ;;  %4085 = vmatpush3.bf16.msra.mxu1 %v4082_v62 }
0x10ca   :  { %4087 = vmatprep.subr.bf16.mxu1 %v4086_v1 }
0x10cc   :  { %4065 = vmatpush3.bf16.msra.mxu0 %v4062_v18 }
0x10cd   :  { %4089 = vmatpush3.bf16.msra.mxu1 %v4086_v1 }
0x10ce   :  { %4091 = vmatprep.subr.bf16.mxu1 %v4090_v10 }
0x10d1   :  { %4093 = vmatpush3.bf16.msra.mxu1 %v4090_v10 }
0x1153   :  { %v2895_v15 = vpop.xlane.xlu1 %2894 }
0x1154   :  { %v2897_v22 = vmul.f32 0.03125, %v2895_v15  ;;  %v2892_v45 = vpop.xlane.xlu0 %2891 }
0x1155   :  { %v2896_v49 = vmul.f32 0.03125, %v2892_v45 }
0x1156   :  { %v2899_v23 = vsub.f32 %v2889_v13, %v2897_v22  ;;  %v3437_v13 = vld [vmem:[%s5019_s10 + $0xf8] sm:$0xff] }
0x1157   :  { %v2898_v42 = vsub.f32 %v2888_v14, %v2896_v49  ;;  %v4094_v14 = vpack.c.bf16 %v3437_v13, %v3436_v12 }
0x1158   :  { %v2901_v25 = vmul.f32 %v2899_v23, %v2899_v23 }
0x1159   :  { %v2900_v24 = vmul.f32 %v2898_v42, %v2898_v42  ;;  %4095 = vmatprep.subr.bf16.mxu1 %v4094_v14 }
0x115a   :  { %v2905_v39 = vsel %vm53_vm0, %v2901_v25, 0.0  ;;  %4097 = vmatpush3.bf16.msra.mxu1 %v4094_v14 }
0x115b   :  { %v2902_v56 = vsel %vm53_vm0, %v2900_v24, 0.0 }
0x115c   :  { %2903 = vadd.xlane.f32.xlu0 %v2902_v56 }
0x1160   :  { %2906 = vadd.xlane.f32.xlu0 %v2905_v39 }
0x11e9   :  { %v2904_v31 = vpop.xlane.xlu0 %2903 }
0x11ea   :  { %v2908_v32 = vmul.f32 0.03125, %v2904_v31 }
0x11ec   :  { %v2910_v33 = vadd.f32 1e-12, %v2908_v32 }
0x11ed   :  { %v2907_v53 = vpop.xlane.xlu0 %2906 }
0x11ee   :  { %4278 = vrsqrt.f32 %v2910_v33  ;;  %v2909_v35 = vmul.f32 0.03125, %v2907_v53  ;;  %v3036_v33 = vrot.slane %v4865_v8, %v1504_v3 }
0x11f0   :  { %v2911_v37 = vadd.f32 1e-12, %v2909_v35 }
0x11f2   :  { %4280 = vrsqrt.f32 %v2911_v37 }
0x11f8   :  { %v4279_v40 = vpop.eup %4278 }
0x11f9   :  { %v2914_v41 = vmul.f32 %v4279_v40, %v2898_v42 }
0x11fb   :  { %v2920_v47 = vmul.f32 %v2919_v38, %v2914_v41 }
0x11fc   :  { %v4281_v48 = vpop.eup %4280 }
0x11fd   :  { %v2915_v50 = vmul.f32 %v4281_v48, %v2899_v23  ;;  %v4904_v51 = vadd.f32 %v2925_v46, %v2920_v47 }
0x11ff   :  { %v2921_v52 = vmul.f32 %v2919_v38, %v2915_v50  ;;  %3866 = vmatprep.mubr.msk.f32.mxu0 %vm53_vm0, %v4904_v51 }
0x1201   :  { %v4908_v36 = vadd.f32 %v2925_v46, %v2921_v52 }
0x1203   :  { %3867 = vmatmul.mubr.msk.f32.vlgmr.msra.gmra.mrb[32].mxu0 %vm53_vm0, %v4908_v36 }
0x12d6   :  { %v3868_v19 = vpop.f32.mrb[32].mxu0 }
0x12d7   :  { %v3012_v15 = vadd.f32 %v3868_v19, %v3473_v16  ;;  %v3006_v22 = vpop.f32.mrb[33].mxu0 }
0x12d8   :  { %v3007_v45 = vadd.f32 %v3473_v16, %v3006_v22  ;;  %v3149_v16 = vrot.slane %v4865_v8, %v1617_v44 }
0x12d9   :  { %v3018_v49 = vmul.f32 0.044715, %v3012_v15  ;;  %v3016_v30 = vmul.f32 0.5, %v3012_v15 }
0x12da   :  { %v3017_v23 = vmul.f32 0.044715, %v3007_v45  ;;  %v3015_v28 = vmul.f32 0.5, %v3007_v45 }
0x12db   :  { %v3020_v42 = vmul.f32 %v3018_v49, %v3012_v15  ;;  %v4323_v49 = vmov 0.0|0.0  }
0x12dc   :  { %v3019_v24 = vmul.f32 %v3017_v23, %v3007_v45  ;;  %v3238_v23 = vand.u32 127, %v1351_v9 }
0x12dd   :  { %v3022_v56 = vmul.f32 %v3020_v42, %v3012_v15  ;;  %v3241_v42 = vmul.u32 8, %v4591_v11 }
0x12de   :  { %v3021_v25 = vmul.f32 %v3019_v24, %v3007_v45 }
0x12df   :  { %v3024_v39 = vadd.f32 %v3022_v56, %v3012_v15  ;;  %vm3242_vm5 = vcmp.eq.s32.totalorder %v3238_v23, %v3241_v42 }
0x12e0   :  { %v3023_v54 = vadd.f32 %v3021_v25, %v3007_v45  ;;  %v3478_v8 = vsel %vm3242_vm5, 1.0, %v4325_v43  ;;  %v3479_v25 = vld [vmem:[#allocation2] ss:$0 sm:$0xff] }
0x12e1   :  { %v3026_v26 = vmul.f32 0.7978846, %v3024_v39 }
0x12e2   :  { %v3025_v27 = vmul.f32 0.7978846, %v3023_v54 }
0x12e3   :  { %4282 = vtanh.f32 %v3026_v26 }
0x12e4   :  { %4284 = vtanh.f32 %v3025_v27 }
0x12ed   :  { %v4283_v5 = vpop.eup %4282 }
0x12ee   :  { %v4285_v21 = vpop.eup %4284  ;;  %v3030_v18 = vadd.f32 1.0, %v4283_v5 }
0x12ef   :  { %v3029_v29 = vadd.f32 1.0, %v4285_v21 }
0x12f0   :  { %v3032_v32 = vmul.f32 %v3030_v18, %v3016_v30  ;;  %v3327_v18 = vld [vmem:[%s5011_s2] sm:$0x3] }
0x12f1   :  { %v3031_v31 = vmul.f32 %v3029_v29, %v3015_v28 }
0x12f3   :  { %3901 = vmatprep.mubr.f32.mxu1 %v3031_v31 }
0x12f4   :  { %3902 = vmatmul.mubr.f32.vlgmr.msra.gmra.mrb[24].mxu1 %v3032_v32 }
0x13c7   :  { %v3903_v53 = vpop.f32.mrb[24].mxu1 }
0x13c8   :  { %v3109_v35 = vadd.f32 %v3903_v53, %v3036_v33  ;;  %v3103_v37 = vpop.f32.mrb[25].mxu1 }
0x13c9   :  { %v3104_v38 = vadd.f32 %v3103_v37, %v3036_v33 }
0x13ca   :  { %v3113_v40 = vadd.f32 %v3109_v35, %v4908_v36 }
0x13cb   :  { %v3112_v41 = vadd.f32 %v3104_v38, %v4904_v51  ;;  %v3152_v51 = vld [vmem:[%s5020_s11] sm:$0xff] }
0x13cc   :  { %v3117_v46 = vsel %vm53_vm0, %v3113_v40, 0.0  ;;  %v4098_v60 = vpack.c.bf16 %v3153_v57, %v3152_v51 }
0x13cd   :  { %3118 = vadd.xlane.f32.xlu1 %v3117_v46  ;;  %v3114_v47 = vsel %vm53_vm0, %v3112_v41, 0.0 }
0x13ce   :  { %3115 = vadd.xlane.f32.xlu0 %v3114_v47  ;;  %4099 = vmatprep.subr.bf16.mxu0 %v4098_v60 }
0x13cf   :  { %4101 = vmatpush3.bf16.msra.mxu0 %v4098_v60 }
0x13d0   :  { %4103 = vmatprep.subr.bf16.mxu0 %v4102_v59 }
0x13d3   :  { %4105 = vmatpush3.bf16.msra.mxu0 %v4102_v59 }
0x13d4   :  { %4106 = vmatprep.subr.bf16.mxu0 %v4323_v49 }
0x145a   :  { %v3119_v48 = vpop.xlane.xlu1 %3118 }
0x145b   :  { %v3121_v50 = vmul.f32 0.03125, %v3119_v48  ;;  %v3116_v52 = vpop.xlane.xlu0 %3115 }
0x145c   :  { %v3120_v4 = vmul.f32 0.03125, %v3116_v52 }
0x145d   :  { %v3123_v7 = vsub.f32 %v3113_v40, %v3121_v50 }
0x145e   :  { %v3122_v3 = vsub.f32 %v3112_v41, %v3120_v4 }
0x145f   :  { %v3125_v63 = vmul.f32 %v3123_v7, %v3123_v7 }
0x1460   :  { %v3124_v34 = vmul.f32 %v3122_v3, %v3122_v3 }
0x1461   :  { %v3129_v55 = vsel %vm53_vm0, %v3125_v63, 0.0 }
0x1462   :  { %3130 = vadd.xlane.f32.xlu1 %v3129_v55  ;;  %v3126_v36 = vsel %vm53_vm0, %v3124_v34, 0.0 }
0x1463   :  { %3127 = vadd.xlane.f32.xlu0 %v3126_v36 }
0x14ef   :  { %v3131_v20 = vpop.xlane.xlu1 %3130 }
0x14f0   :  { %v3133_v61 = vmul.f32 0.03125, %v3131_v20  ;;  %v3128_v62 = vpop.xlane.xlu0 %3127 }
0x14f1   :  { %v3132_v0 = vmul.f32 0.03125, %v3128_v62 }
0x14f2   :  { %v3135_v1 = vadd.f32 1e-12, %v3133_v61 }
0x14f3   :  { %v3134_v2 = vadd.f32 1e-12, %v3132_v0 }
0x14f4   :  { %4286 = vrsqrt.f32 %v3135_v1 }
0x14f5   :  { %4288 = vrsqrt.f32 %v3134_v2 }
0x14fe   :  { %v4287_v10 = vpop.eup %4286 }
0x14ff   :  { %v4289_v12 = vpop.eup %4288  ;;  %v3139_v13 = vmul.f32 %v4287_v10, %v3123_v7 }
0x1500   :  { %v3138_v14 = vmul.f32 %v4289_v12, %v3122_v3 }
0x1501   :  { %v3145_v19 = vmul.f32 %v3143_v6, %v3139_v13 }
0x1502   :  { %v3144_v15 = vmul.f32 %v3143_v6, %v3138_v14 }
0x1503   :  { %v3151_v45 = vadd.f32 %v3149_v16, %v3145_v19 }
0x1504   :  { %v3150_v22 = vadd.f32 %v3149_v16, %v3144_v15 }
0x1506   :  { %3912 = vmatprep.mubr.msk.f32.mxu0 %vm53_vm0, %v3150_v22 }
0x1507   :  { %3913 = vmatmul.mubr.msk.f32.vlgmr.msra.gmra.mrb[34].mxu0 %vm53_vm0, %v3151_v45 }
0x1508   :  { %3919 = vmatprep.mubr.msk.f32.mxu0 %vm4324_vm4, %v4325_v43 }
0x15da   :  { %v3914_v24 = vpop.f32.mrb[34].mxu0 }
0x15db   :  { %v3228_v56 = vpop.f32.mrb[35].mxu0 }
0x15dc   :  { %v4107_v44 = vpack.c.bf16 %v3914_v24, %v3228_v56 }
0x15de   :  { %4108 = vmatpush3.bf16.msra.mxu0 %v4107_v44 }
0x15e1   :  { %3920 = vmatmul.mubr.msk.f32.vlgmr.msra.gmra.mrb[36].mxu0 %vm576_vm3, %v3478_v8 }
0x16b4   :  { %v3321_v39 = vpop.f32.mrb[36].mxu0 }
0x16b5   :  { %v3322_v54 = vadd.f32 %v3479_v25, %v3321_v39  ;;  %v3921_v26 = vpop.f32.mrb[37].mxu0 }
0x16b7   :  { %3326 = vst.msk [vmem:[%s5022_s13] sm:$0x3] %vm3325_vm6, %v3322_v54  ;;  %v3331_v9 = vand.u32 2147483647, %v3322_v54  ;;  %v3328_v28 = vmax.f32 %v3322_v54, 0.0  ;;  %v3329_v29 = vmul.f32 %v3327_v18, %v3322_v54  ;;  %s4326_s13 = smov [#allocation3]  }
0x16b8   :  { %s3357_s24 = sshll.u32 %s4326_s13, 4  ;;  %s3358_s24 = int_to_ptr.vmem [resolvable:$true] %s3357_s24 }
0x16b9   :  { %v3332_v11 = vsub.f32 0.0, %v3331_v9  ;;  %v3330_v31 = vsub.f32 %v3328_v28, %v3329_v29  ;;  %s4294_s2 = scalar_lea.vmem %s3358_s24, 16  ;;  %s4298_s25 = scalar_lea.vmem %s3358_s24, 32 }
0x16ba   :  { %p4295_p0 = scmp.ne.s32.totalorder %s3358_s24, %s4294_s2  ;;  %p4299_p1 = scmp.lt.s32.totalorder %s3358_s24, %s3358_s24 }
0x16bb   :  { %v3333_v27 = vmul.f32 1.442695, %v3332_v11  ;;  %p4300_p2 = scmp.lt.s32.totalorder %s4298_s25, %s4294_s2 }
0x16bd   :  { %4290 = vpow2.f32 %v3333_v27  ;;  %p4301_p3 = por %p4300_p2, %p4299_p1 }
0x16bf   :  { %p4302_p4 = pnand %p4301_p3, %p4295_p0 }
0x16c7   :  { %v4291_v5 = vpop.eup %4290 }
0x16c8   :  { %v3335_v21 = vadd.f32 1.0, %v4291_v5 }
0x16ca   :  { %4292 = vlog2.f32 %v3335_v21 }
0x16d4   :  { %v4293_v30 = vpop.eup %4292 }
0x16d5   :  { %v3337_v32 = vmul.f32 0.6931472, %v4293_v30 }
0x16d7   :  { %v3338_v33 = vadd.f32 %v3337_v32, %v3330_v31 }
0x16d9   :  { %v3339_v53 = vsel %vm3325_vm6, %v3338_v33, 0.0 }
0x16da   :  { %v3340_v35 = vrot.slane %v3339_v53, 4 }
0x16dc   :  { %v3341_v37 = vadd.f32 %v3340_v35, %v3339_v53 }
0x16de   :  { %v3342_v38 = vrot.slane %v3341_v37, 2 }
0x16e0   :  { %v3343_v40 = vadd.f32 %v3342_v38, %v3341_v37 }
0x16e2   :  { %v3344_v41 = vrot.slane %v3343_v40, 1 }
0x16e4   :  { %v3345_v46 = vadd.f32 %v3344_v41, %v3343_v40 }
0x16e6   :  { %v3346_v47 = vmul.f32 0.5, %v3345_v46 }
0x16e8   :  { %3348 = vst.msk [vmem:[#allocation3] sm:$0x1] %vm3347_vm7, %v3346_v47 }
0x16e9   :  { %4305 = shalt.err (!%p4302_p4)
}
0x16ea   :  { %s4306_s28 = scalar_lea.hbm %s5023_s14, 16 }
0x16eb   :  { %p4307_p5 = scmp.ne.s32.totalorder %s5023_s14, %s4306_s28  ;;  %p4310_p6 = scmp.lt.u32.totalorder %s4306_s28, %s5023_s14 }
0x16ed   :  { %p4312_p7 = pnand %p4310_p6, %p4307_p5 }
0x16ef   :  { %4315 = shalt.err (!%p4312_p7)
}
0x16f0   :  { %3360 = dma.vmem_to_hbm [thread:$0]  %s3358_s24, 16, %s5023_s14, [#allocation4]  }
0x16f1   :  { %4316 = dma.done.wait [#allocation4], 16  }
0x16f2   :  { %4317 = vsyncadd [#allocation4], 4294967280 }
0x16f3   :  { %3366 = vsyncpa [#allocation4], 1 }

</bundles_post_ra>
